<compile_context>
chip_gen: v5e
topology: v5e:2x2
jax: 0.10.0
libtpu: 0.0.40
codegen_flags: <defaults>
</compile_context>

<pallas_src>
import jax
import jax.numpy as jnp
from jax import lax
from jax.experimental import pallas as pl
from jax.experimental.pallas import tpu as pltpu

KSIZE = 7
PAD = KSIZE // 2  # = 3, same-padding as in the PyTorch module


def _pick_c_chunk(C, max_chunk=128):
    """Channel chunk size: full C when small, else a multiple-of-8 divisor."""
    if C <= max_chunk:
        return C
    for tc in range(max_chunk, 7, -8):  # 128, 120, ..., 8
        if C % tc == 0:
            return tc
    return C  # fallback: whole C per grid step


def _make_kernel(C, H, W, TC, num_cc):
    HW = H * W
    KK = KSIZE * KSIZE

    def kernel(w_ref, col_ref, x_ref, o_ref, sum_ref, max_ref):
        # w_ref  : SMEM (2*7*7,) f32      -- flattened conv1 weight (O=1, I=2, 7, 7)
        # col_ref: VMEM (1, H*W) i32      -- column index of each flat position
        # x_ref  : VMEM (1, TC, H*W)      -- one channel-chunk of one batch element
        # o_ref  : VMEM (1, 1, H*W) f32   -- sigmoid attention map (flat, lane-dense)
        # sum_ref/max_ref : VMEM (1, H*W) f32 running channel sum / channel max
        cc = pl.program_id(1)

        @pl.when(cc == 0)
        def _init():
            sum_ref[...] = jnp.zeros((1, HW), jnp.float32)
            max_ref[...] = jnp.full((1, HW), -jnp.inf, jnp.float32)

        # ---- fused single-pass channel reduction over this chunk ----
        if TC % 8 == 0 and TC > 8:
            # Stream the chunk in 8-sublane groups to keep vreg liveness small.
            def body(g, carry):
                s, m = carry
                sub = x_ref[0, pl.ds(pl.multiple_of(g * 8, 8), 8), :]
                sub = sub.astype(jnp.float32)                        # (8, HW)
                return (s + jnp.sum(sub, axis=0, keepdims=True),
                        jnp.maximum(m, jnp.max(sub, axis=0, keepdims=True)))
            s, m = lax.fori_loop(
                0, TC // 8, body,
                (jnp.zeros((1, HW), jnp.float32),
                 jnp.full((1, HW), -jnp.inf, jnp.float32)))
            sum_ref[...] = sum_ref[...] + s
            max_ref[...] = jnp.maximum(max_ref[...], m)
        else:
            blk = x_ref[0].astype(jnp.float32)                       # (TC, HW)
            sum_ref[...] = sum_ref[...] + jnp.sum(blk, axis=0, keepdims=True)
            max_ref[...] = jnp.maximum(max_ref[...],
                                       jnp.max(blk, axis=0, keepdims=True))

        # ---- finalize: 7x7 conv over [avg, max] + sigmoid on the flat maps ----
        @pl.when(cc == num_cc - 1)
        def _finalize():
            avg = sum_ref[...] * jnp.float32(1.0 / C)                # (1, HW)
            mx = max_ref[...]                                        # (1, HW)
            col = col_ref[...]                                       # (1, HW) i32

            def shift_zero(v, s):
                # y[p] = v[p + s] when 0 <= p + s < HW, else 0 (s is static).
                # The zero fill doubles as the conv's zero padding in the row
                # direction, so no row masks are needed.
                if s == 0:
                    return v
                if s > 0:
                    return jnp.concatenate(
                        [v[:, s:], jnp.zeros((1, s), jnp.float32)], axis=1)
                return jnp.concatenate(
                    [jnp.zeros((1, -s), jnp.float32), v[:, :HW + s]], axis=1)

            # Column-validity masks (shared by both channels and all row offsets).
            col_masks = [((col + dj >= 0) & (col + dj < W)).astype(jnp.float32)
                         for dj in range(-PAD, PAD + 1)]

            n_acc = 4                     # break the serial accumulator chain
            parts = [jnp.zeros((1, HW), jnp.float32) for _ in range(n_acc)]
            t = 0
            for ch, plane in enumerate((avg, mx)):
                # Hoisted lane shifts: one shifted+masked copy per column
                # offset, reused by all 7 row offsets.
                shifted_cols = [shift_zero(plane, dj) * col_masks[dj + PAD]
                                for dj in range(-PAD, PAD + 1)]
                for di in range(-PAD, PAD + 1):
                    h = jnp.zeros((1, HW), jnp.float32)
                    for dj in range(-PAD, PAD + 1):
                        w = w_ref[ch * KK + (di + PAD) * KSIZE + (dj + PAD)]
                        h = h + w * shifted_cols[dj + PAD]
                    parts[t % n_acc] = parts[t % n_acc] + shift_zero(h, di * W)
                    t += 1
            acc = (parts[0] + parts[1]) + (parts[2] + parts[3])
            o_ref[0] = jax.nn.sigmoid(acc)

    return kernel


def spatial_attention(x, weight):
    """x: (B, C, H, W) any float dtype; weight: (1, 2, 7, 7) conv weight (no bias).

    Returns the (B, 1, H, W) float32 sigmoid attention map.
    """
    B, C, H, W = x.shape
    HW = H * W
    # Lane-dense layout; keep the native dtype (the kernel upcasts per chunk
    # and accumulates in f32).
    x_flat = x.reshape(B, C, HW)
    w_flat = weight.reshape(-1).astype(jnp.float32)                  # (98,)
    col_idx = jnp.tile(jnp.arange(W, dtype=jnp.int32), H).reshape(1, HW)

    TC = _pick_c_chunk(C)
    num_cc = C // TC
    kernel = _make_kernel(C, H, W, TC, num_cc)

    out_flat = pl.pallas_call(
        kernel,
        out_shape=jax.ShapeDtypeStruct((B, 1, HW), jnp.float32),
        grid_spec=pltpu.PrefetchScalarGridSpec(
            num_scalar_prefetch=0,
            grid=(B, num_cc),
            in_specs=[
                pl.BlockSpec(memory_space=pltpu.MemorySpace.SMEM),     # weights
                pl.BlockSpec((1, HW), lambda b, cc: (0, 0)),           # col idx
                pl.BlockSpec((1, TC, HW), lambda b, cc: (b, cc, 0)),   # x chunk
            ],
            out_specs=pl.BlockSpec((1, 1, HW), lambda b, cc: (b, 0, 0)),
            scratch_shapes=[
                pltpu.VMEM((1, HW), jnp.float32),   # running channel sum
                pltpu.VMEM((1, HW), jnp.float32),   # running channel max
            ],
        ),
        compiler_params=pltpu.CompilerParams(
            # batch axis parallel (v7x: shard across both TensorCores);
            # channel-chunk axis is a reduction -> arbitrary.
            dimension_semantics=("parallel", "arbitrary"),
        ),
    )(w_flat, col_idx, x_flat)
    return out_flat.reshape(B, 1, H, W)


def spatial_attention_ref(x, weight):
    """Pure-JAX reference matching the PyTorch forward."""
    x = x.astype(jnp.float32)
    avg = jnp.mean(x, axis=1, keepdims=True)
    mx = jnp.max(x, axis=1, keepdims=True)
    feat = jnp.concatenate([avg, mx], axis=1)                        # (B, 2, H, W)
    y = lax.conv_general_dilated(
        feat, weight.astype(jnp.float32), window_strides=(1, 1),
        padding=[(PAD, PAD), (PAD, PAD)],
        dimension_numbers=("NCHW", "OIHW", "NCHW"))
    return jax.nn.sigmoid(y)


if __name__ == "__main__":
    key = jax.random.PRNGKey(0)
    kx, kw = jax.random.split(key)

    # Small shapes consistent with the module's forward.
    B, C, H, W = 2, 4, 16, 16
    x = jax.random.normal(kx, (B, C, H, W), dtype=jnp.float32)

    # Deterministic synthetic conv1 weight: (out=1, in=2, 7, 7), no bias.
    fan_in = 2 * KSIZE * KSIZE
    weight = jax.random.uniform(
        kw, (1, 2, KSIZE, KSIZE), dtype=jnp.float32,
        minval=-1.0, maxval=1.0) / jnp.sqrt(fan_in)

    out = spatial_attention(x, weight)
    out = jax.block_until_ready(out)

    ref = spatial_attention_ref(x, weight)
    assert out.shape == (B, 1, H, W), out.shape
    assert jnp.allclose(out, ref, atol=1e-5, rtol=1e-5), (
        float(jnp.max(jnp.abs(out - ref))))
    print("KERNEL_OK")
</pallas_src>

<mosaic_0001>
module attributes {stable_mosaic.version = 11 : i64} {
  func.func @kernel(%arg0: i32, %arg1: i32, %arg2: memref<98xf32, #tpu.memory_space<smem>>, %arg3: memref<1x256xi32, #tpu.memory_space<vmem>>, %arg4: memref<1x4x256xf32, #tpu.memory_space<vmem>>, %arg5: memref<1x1x256xf32, #tpu.memory_space<vmem>>, %arg6: memref<1x256xf32, #tpu.memory_space<vmem>>, %arg7: memref<1x256xf32, #tpu.memory_space<vmem>>) attributes {dimension_semantics = [#tpu.dimension_semantics<parallel>, #tpu.dimension_semantics<arbitrary>], iteration_bounds = array<i64: 2, 1>, scalar_prefetch = 0 : i64, scratch_operands = 2 : i64, tpu.core_type = #tpu.core_type<tc>, window_params = [{transform_indices = @transform_0, window_bounds = array<i64: 98>}, {pipeline_mode = #tpu.pipeline_mode<synchronous>, transform_indices = @transform_1, window_bounds = array<i64: 1, 256>}, {transform_indices = @transform_2, window_bounds = array<i64: 1, 4, 256>}, {transform_indices = @transform_3, window_bounds = array<i64: 1, 1, 256>}]} {
    %c0_i32 = arith.constant 0 : i32
    %0 = arith.cmpi eq, %arg1, %c0_i32 : i32
    %1 = arith.extui %0 : i1 to i32
    %c0_i32_0 = arith.constant 0 : i32
    %2 = arith.cmpi ne, %1, %c0_i32_0 : i32
    scf.if %2 {
      %cst_14 = arith.constant 0.000000e+00 : f32
      %18 = vector.broadcast %cst_14 : f32 to vector<1x256xf32>
      %c0_15 = arith.constant 0 : index
      %c0_16 = arith.constant 0 : index
      %19 = vector.load %arg6[%c0_15, %c0_16] : memref<1x256xf32, #tpu.memory_space<vmem>>, vector<1x256xf32>
      tpu.vector_store %arg6[%c0_15, %c0_16], %18 {strides = array<i32>} : memref<1x256xf32, #tpu.memory_space<vmem>>, vector<1x256xf32>,
      %cst_17 = arith.constant 0xFF800000 : f32
      %20 = vector.broadcast %cst_17 : f32 to vector<1x256xf32>
      %c0_18 = arith.constant 0 : index
      %c0_19 = arith.constant 0 : index
      %21 = vector.load %arg7[%c0_18, %c0_19] : memref<1x256xf32, #tpu.memory_space<vmem>>, vector<1x256xf32>
      tpu.vector_store %arg7[%c0_18, %c0_19], %20 {strides = array<i32>} : memref<1x256xf32, #tpu.memory_space<vmem>>, vector<1x256xf32>,
    } else {
    }
    %c0 = arith.constant 0 : index
    %c0_1 = arith.constant 0 : index
    %c0_2 = arith.constant 0 : index
    %3 = vector.load %arg4[%c0, %c0_1, %c0_2] : memref<1x4x256xf32, #tpu.memory_space<vmem>>, vector<1x4x256xf32>
    %4 = vector.shape_cast %3 : vector<1x4x256xf32> to vector<4x256xf32>
    %c0_3 = arith.constant 0 : index
    %c0_4 = arith.constant 0 : index
    %5 = vector.load %arg6[%c0_3, %c0_4] : memref<1x256xf32, #tpu.memory_space<vmem>>, vector<1x256xf32>
    %cst = arith.constant dense<0.000000e+00> : vector<256xf32>
    %6 = vector.multi_reduction <add>, %4, %cst [0] : vector<4x256xf32> to vector<256xf32>
    %7 = vector.shape_cast %6 : vector<256xf32> to vector<1x256xf32>
    %8 = arith.addf %5, %7 : vector<1x256xf32>
    %c0_5 = arith.constant 0 : index
    %c0_6 = arith.constant 0 : index
    %9 = vector.load %arg6[%c0_5, %c0_6] : memref<1x256xf32, #tpu.memory_space<vmem>>, vector<1x256xf32>
    tpu.vector_store %arg6[%c0_5, %c0_6], %8 {strides = array<i32>} : memref<1x256xf32, #tpu.memory_space<vmem>>, vector<1x256xf32>,
    %c0_7 = arith.constant 0 : index
    %c0_8 = arith.constant 0 : index
    %10 = vector.load %arg7[%c0_7, %c0_8] : memref<1x256xf32, #tpu.memory_space<vmem>>, vector<1x256xf32>
    %cst_9 = arith.constant dense<0xFF800000> : vector<256xf32>
    %11 = vector.multi_reduction <maximumf>, %4, %cst_9 [0] : vector<4x256xf32> to vector<256xf32>
    %12 = vector.shape_cast %11 : vector<256xf32> to vector<1x256xf32>
    %13 = arith.maximumf %10, %12 : vector<1x256xf32>
    %c0_10 = arith.constant 0 : index
    %c0_11 = arith.constant 0 : index
    %14 = vector.load %arg7[%c0_10, %c0_11] : memref<1x256xf32, #tpu.memory_space<vmem>>, vector<1x256xf32>
    tpu.vector_store %arg7[%c0_10, %c0_11], %13 {strides = array<i32>} : memref<1x256xf32, #tpu.memory_space<vmem>>, vector<1x256xf32>,
    %c0_i32_12 = arith.constant 0 : i32
    %15 = arith.cmpi eq, %arg1, %c0_i32_12 : i32
    %16 = arith.extui %15 : i1 to i32
    %c0_i32_13 = arith.constant 0 : i32
    %17 = arith.cmpi ne, %16, %c0_i32_13 : i32
    scf.if %17 {
      %c0_14 = arith.constant 0 : index
      %c0_15 = arith.constant 0 : index
      %18 = vector.load %arg6[%c0_14, %c0_15] : memref<1x256xf32, #tpu.memory_space<vmem>>, vector<1x256xf32>
      %cst_16 = arith.constant 2.500000e-01 : f32
      %19 = vector.broadcast %cst_16 : f32 to vector<1x256xf32>
      %20 = arith.mulf %18, %19 : vector<1x256xf32>
      %c0_17 = arith.constant 0 : index
      %c0_18 = arith.constant 0 : index
      %21 = vector.load %arg7[%c0_17, %c0_18] : memref<1x256xf32, #tpu.memory_space<vmem>>, vector<1x256xf32>
      %c0_19 = arith.constant 0 : index
      %c0_20 = arith.constant 0 : index
      %22 = vector.load %arg3[%c0_19, %c0_20] : memref<1x256xi32, #tpu.memory_space<vmem>>, vector<1x256xi32>
      %c-3_i32 = arith.constant -3 : i32
      %23 = vector.broadcast %c-3_i32 : i32 to vector<1x256xi32>
      %24 = arith.addi %22, %23 : vector<1x256xi32>
      %c0_i32_21 = arith.constant 0 : i32
      %25 = vector.broadcast %c0_i32_21 : i32 to vector<1x256xi32>
      %26 = arith.cmpi sge, %24, %25 : vector<1x256xi32>
      %c-3_i32_22 = arith.constant -3 : i32
      %27 = vector.broadcast %c-3_i32_22 : i32 to vector<1x256xi32>
      %28 = arith.addi %22, %27 : vector<1x256xi32>
      %c16_i32 = arith.constant 16 : i32
      %29 = vector.broadcast %c16_i32 : i32 to vector<1x256xi32>
      %30 = arith.cmpi slt, %28, %29 : vector<1x256xi32>
      %31 = arith.andi %26, %30 : vector<1x256xi1>
      %32 = arith.extui %31 : vector<1x256xi1> to vector<1x256xi32>
      %33 = arith.sitofp %32 : vector<1x256xi32> to vector<1x256xf32>
      %c-2_i32 = arith.constant -2 : i32
      %34 = vector.broadcast %c-2_i32 : i32 to vector<1x256xi32>
      %35 = arith.addi %22, %34 : vector<1x256xi32>
      %c0_i32_23 = arith.constant 0 : i32
      %36 = vector.broadcast %c0_i32_23 : i32 to vector<1x256xi32>
      %37 = arith.cmpi sge, %35, %36 : vector<1x256xi32>
      %c-2_i32_24 = arith.constant -2 : i32
      %38 = vector.broadcast %c-2_i32_24 : i32 to vector<1x256xi32>
      %39 = arith.addi %22, %38 : vector<1x256xi32>
      %c16_i32_25 = arith.constant 16 : i32
      %40 = vector.broadcast %c16_i32_25 : i32 to vector<1x256xi32>
      %41 = arith.cmpi slt, %39, %40 : vector<1x256xi32>
      %42 = arith.andi %37, %41 : vector<1x256xi1>
      %43 = arith.extui %42 : vector<1x256xi1> to vector<1x256xi32>
      %44 = arith.sitofp %43 : vector<1x256xi32> to vector<1x256xf32>
      %c-1_i32 = arith.constant -1 : i32
      %45 = vector.broadcast %c-1_i32 : i32 to vector<1x256xi32>
      %46 = arith.addi %22, %45 : vector<1x256xi32>
      %c0_i32_26 = arith.constant 0 : i32
      %47 = vector.broadcast %c0_i32_26 : i32 to vector<1x256xi32>
      %48 = arith.cmpi sge, %46, %47 : vector<1x256xi32>
      %c-1_i32_27 = arith.constant -1 : i32
      %49 = vector.broadcast %c-1_i32_27 : i32 to vector<1x256xi32>
      %50 = arith.addi %22, %49 : vector<1x256xi32>
      %c16_i32_28 = arith.constant 16 : i32
      %51 = vector.broadcast %c16_i32_28 : i32 to vector<1x256xi32>
      %52 = arith.cmpi slt, %50, %51 : vector<1x256xi32>
      %53 = arith.andi %48, %52 : vector<1x256xi1>
      %54 = arith.extui %53 : vector<1x256xi1> to vector<1x256xi32>
      %55 = arith.sitofp %54 : vector<1x256xi32> to vector<1x256xf32>
      %c0_i32_29 = arith.constant 0 : i32
      %56 = vector.broadcast %c0_i32_29 : i32 to vector<1x256xi32>
      %57 = arith.addi %22, %56 : vector<1x256xi32>
      %c0_i32_30 = arith.constant 0 : i32
      %58 = vector.broadcast %c0_i32_30 : i32 to vector<1x256xi32>
      %59 = arith.cmpi sge, %57, %58 : vector<1x256xi32>
      %c0_i32_31 = arith.constant 0 : i32
      %60 = vector.broadcast %c0_i32_31 : i32 to vector<1x256xi32>
      %61 = arith.addi %22, %60 : vector<1x256xi32>
      %c16_i32_32 = arith.constant 16 : i32
      %62 = vector.broadcast %c16_i32_32 : i32 to vector<1x256xi32>
      %63 = arith.cmpi slt, %61, %62 : vector<1x256xi32>
      %64 = arith.andi %59, %63 : vector<1x256xi1>
      %65 = arith.extui %64 : vector<1x256xi1> to vector<1x256xi32>
      %66 = arith.sitofp %65 : vector<1x256xi32> to vector<1x256xf32>
      %c1_i32 = arith.constant 1 : i32
      %67 = vector.broadcast %c1_i32 : i32 to vector<1x256xi32>
      %68 = arith.addi %22, %67 : vector<1x256xi32>
      %c0_i32_33 = arith.constant 0 : i32
      %69 = vector.broadcast %c0_i32_33 : i32 to vector<1x256xi32>
      %70 = arith.cmpi sge, %68, %69 : vector<1x256xi32>
      %c1_i32_34 = arith.constant 1 : i32
      %71 = vector.broadcast %c1_i32_34 : i32 to vector<1x256xi32>
      %72 = arith.addi %22, %71 : vector<1x256xi32>
      %c16_i32_35 = arith.constant 16 : i32
      %73 = vector.broadcast %c16_i32_35 : i32 to vector<1x256xi32>
      %74 = arith.cmpi slt, %72, %73 : vector<1x256xi32>
      %75 = arith.andi %70, %74 : vector<1x256xi1>
      %76 = arith.extui %75 : vector<1x256xi1> to vector<1x256xi32>
      %77 = arith.sitofp %76 : vector<1x256xi32> to vector<1x256xf32>
      %c2_i32 = arith.constant 2 : i32
      %78 = vector.broadcast %c2_i32 : i32 to vector<1x256xi32>
      %79 = arith.addi %22, %78 : vector<1x256xi32>
      %c0_i32_36 = arith.constant 0 : i32
      %80 = vector.broadcast %c0_i32_36 : i32 to vector<1x256xi32>
      %81 = arith.cmpi sge, %79, %80 : vector<1x256xi32>
      %c2_i32_37 = arith.constant 2 : i32
      %82 = vector.broadcast %c2_i32_37 : i32 to vector<1x256xi32>
      %83 = arith.addi %22, %82 : vector<1x256xi32>
      %c16_i32_38 = arith.constant 16 : i32
      %84 = vector.broadcast %c16_i32_38 : i32 to vector<1x256xi32>
      %85 = arith.cmpi slt, %83, %84 : vector<1x256xi32>
      %86 = arith.andi %81, %85 : vector<1x256xi1>
      %87 = arith.extui %86 : vector<1x256xi1> to vector<1x256xi32>
      %88 = arith.sitofp %87 : vector<1x256xi32> to vector<1x256xf32>
      %c3_i32 = arith.constant 3 : i32
      %89 = vector.broadcast %c3_i32 : i32 to vector<1x256xi32>
      %90 = arith.addi %22, %89 : vector<1x256xi32>
      %c0_i32_39 = arith.constant 0 : i32
      %91 = vector.broadcast %c0_i32_39 : i32 to vector<1x256xi32>
      %92 = arith.cmpi sge, %90, %91 : vector<1x256xi32>
      %c3_i32_40 = arith.constant 3 : i32
      %93 = vector.broadcast %c3_i32_40 : i32 to vector<1x256xi32>
      %94 = arith.addi %22, %93 : vector<1x256xi32>
      %c16_i32_41 = arith.constant 16 : i32
      %95 = vector.broadcast %c16_i32_41 : i32 to vector<1x256xi32>
      %96 = arith.cmpi slt, %94, %95 : vector<1x256xi32>
      %97 = arith.andi %92, %96 : vector<1x256xi1>
      %98 = arith.extui %97 : vector<1x256xi1> to vector<1x256xi32>
      %99 = arith.sitofp %98 : vector<1x256xi32> to vector<1x256xf32>
      %cst_42 = arith.constant 0.000000e+00 : f32
      %100 = vector.broadcast %cst_42 : f32 to vector<1x256xf32>
      %cst_43 = arith.constant 0.000000e+00 : f32
      %101 = vector.broadcast %cst_43 : f32 to vector<1x256xf32>
      %cst_44 = arith.constant 0.000000e+00 : f32
      %102 = vector.broadcast %cst_44 : f32 to vector<1x256xf32>
      %cst_45 = arith.constant 0.000000e+00 : f32
      %103 = vector.broadcast %cst_45 : f32 to vector<1x256xf32>
      %cst_46 = arith.constant 0.000000e+00 : f32
      %104 = vector.broadcast %cst_46 : f32 to vector<1x3xf32>
      %105 = vector.extract_strided_slice %20 {offsets = [0, 0], sizes = [1, 253], strides = [1, 1]} : vector<1x256xf32> to vector<1x253xf32>
      %106 = tpu.concatenate %104, %105 in 1 : vector<1x3xf32>, vector<1x253xf32> -> vector<1x256xf32>
      %107 = arith.mulf %106, %33 : vector<1x256xf32>
      %cst_47 = arith.constant 0.000000e+00 : f32
      %108 = vector.broadcast %cst_47 : f32 to vector<1x2xf32>
      %109 = vector.extract_strided_slice %20 {offsets = [0, 0], sizes = [1, 254], strides = [1, 1]} : vector<1x256xf32> to vector<1x254xf32>
      %110 = tpu.concatenate %108, %109 in 1 : vector<1x2xf32>, vector<1x254xf32> -> vector<1x256xf32>
      %111 = arith.mulf %110, %44 : vector<1x256xf32>
      %cst_48 = arith.constant 0.000000e+00 : f32
      %112 = vector.broadcast %cst_48 : f32 to vector<1x1xf32>
      %113 = vector.extract_strided_slice %20 {offsets = [0, 0], sizes = [1, 255], strides = [1, 1]} : vector<1x256xf32> to vector<1x255xf32>
      %114 = tpu.concatenate %112, %113 in 1 : vector<1x1xf32>, vector<1x255xf32> -> vector<1x256xf32>
      %115 = arith.mulf %114, %55 : vector<1x256xf32>
      %116 = arith.mulf %20, %66 : vector<1x256xf32>
      %117 = vector.extract_strided_slice %20 {offsets = [0, 1], sizes = [1, 255], strides = [1, 1]} : vector<1x256xf32> to vector<1x255xf32>
      %cst_49 = arith.constant 0.000000e+00 : f32
      %118 = vector.broadcast %cst_49 : f32 to vector<1x1xf32>
      %119 = tpu.concatenate %117, %118 in 1 : vector<1x255xf32>, vector<1x1xf32> -> vector<1x256xf32>
      %120 = arith.mulf %119, %77 : vector<1x256xf32>
      %121 = vector.extract_strided_slice %20 {offsets = [0, 2], sizes = [1, 254], strides = [1, 1]} : vector<1x256xf32> to vector<1x254xf32>
      %cst_50 = arith.constant 0.000000e+00 : f32
      %122 = vector.broadcast %cst_50 : f32 to vector<1x2xf32>
      %123 = tpu.concatenate %121, %122 in 1 : vector<1x254xf32>, vector<1x2xf32> -> vector<1x256xf32>
      %124 = arith.mulf %123, %88 : vector<1x256xf32>
      %125 = vector.extract_strided_slice %20 {offsets = [0, 3], sizes = [1, 253], strides = [1, 1]} : vector<1x256xf32> to vector<1x253xf32>
      %cst_51 = arith.constant 0.000000e+00 : f32
      %126 = vector.broadcast %cst_51 : f32 to vector<1x3xf32>
      %127 = tpu.concatenate %125, %126 in 1 : vector<1x253xf32>, vector<1x3xf32> -> vector<1x256xf32>
      %128 = arith.mulf %127, %99 : vector<1x256xf32>
      %cst_52 = arith.constant 0.000000e+00 : f32
      %129 = vector.broadcast %cst_52 : f32 to vector<1x256xf32>
      %c0_53 = arith.constant 0 : index
      %130 = memref.load %arg2[%c0_53] : memref<98xf32, #tpu.memory_space<smem>>
      %131 = vector.broadcast %130 : f32 to vector<1x256xf32>
      %132 = arith.mulf %131, %107 : vector<1x256xf32>
      %133 = arith.addf %129, %132 : vector<1x256xf32>
      %c1 = arith.constant 1 : index
      %134 = memref.load %arg2[%c1] : memref<98xf32, #tpu.memory_space<smem>>
      %135 = vector.broadcast %134 : f32 to vector<1x256xf32>
      %136 = arith.mulf %135, %111 : vector<1x256xf32>
      %137 = arith.addf %133, %136 : vector<1x256xf32>
      %c2 = arith.constant 2 : index
      %138 = memref.load %arg2[%c2] : memref<98xf32, #tpu.memory_space<smem>>
      %139 = vector.broadcast %138 : f32 to vector<1x256xf32>
      %140 = arith.mulf %139, %115 : vector<1x256xf32>
      %141 = arith.addf %137, %140 : vector<1x256xf32>
      %c3 = arith.constant 3 : index
      %142 = memref.load %arg2[%c3] : memref<98xf32, #tpu.memory_space<smem>>
      %143 = vector.broadcast %142 : f32 to vector<1x256xf32>
      %144 = arith.mulf %143, %116 : vector<1x256xf32>
      %145 = arith.addf %141, %144 : vector<1x256xf32>
      %c4 = arith.constant 4 : index
      %146 = memref.load %arg2[%c4] : memref<98xf32, #tpu.memory_space<smem>>
      %147 = vector.broadcast %146 : f32 to vector<1x256xf32>
      %148 = arith.mulf %147, %120 : vector<1x256xf32>
      %149 = arith.addf %145, %148 : vector<1x256xf32>
      %c5 = arith.constant 5 : index
      %150 = memref.load %arg2[%c5] : memref<98xf32, #tpu.memory_space<smem>>
      %151 = vector.broadcast %150 : f32 to vector<1x256xf32>
      %152 = arith.mulf %151, %124 : vector<1x256xf32>
      %153 = arith.addf %149, %152 : vector<1x256xf32>
      %c6 = arith.constant 6 : index
      %154 = memref.load %arg2[%c6] : memref<98xf32, #tpu.memory_space<smem>>
      %155 = vector.broadcast %154 : f32 to vector<1x256xf32>
      %156 = arith.mulf %155, %128 : vector<1x256xf32>
      %157 = arith.addf %153, %156 : vector<1x256xf32>
      %cst_54 = arith.constant 0.000000e+00 : f32
      %158 = vector.broadcast %cst_54 : f32 to vector<1x48xf32>
      %159 = vector.extract_strided_slice %157 {offsets = [0, 0], sizes = [1, 208], strides = [1, 1]} : vector<1x256xf32> to vector<1x208xf32>
      %160 = tpu.concatenate %158, %159 in 1 : vector<1x48xf32>, vector<1x208xf32> -> vector<1x256xf32>
      %161 = arith.addf %100, %160 : vector<1x256xf32>
      %cst_55 = arith.constant 0.000000e+00 : f32
      %162 = vector.broadcast %cst_55 : f32 to vector<1x256xf32>
      %c7 = arith.constant 7 : index
      %163 = memref.load %arg2[%c7] : memref<98xf32, #tpu.memory_space<smem>>
      %164 = vector.broadcast %163 : f32 to vector<1x256xf32>
      %165 = arith.mulf %164, %107 : vector<1x256xf32>
      %166 = arith.addf %162, %165 : vector<1x256xf32>
      %c8 = arith.constant 8 : index
      %167 = memref.load %arg2[%c8] : memref<98xf32, #tpu.memory_space<smem>>
      %168 = vector.broadcast %167 : f32 to vector<1x256xf32>
      %169 = arith.mulf %168, %111 : vector<1x256xf32>
      %170 = arith.addf %166, %169 : vector<1x256xf32>
      %c9 = arith.constant 9 : index
      %171 = memref.load %arg2[%c9] : memref<98xf32, #tpu.memory_space<smem>>
      %172 = vector.broadcast %171 : f32 to vector<1x256xf32>
      %173 = arith.mulf %172, %115 : vector<1x256xf32>
      %174 = arith.addf %170, %173 : vector<1x256xf32>
      %c10 = arith.constant 10 : index
      %175 = memref.load %arg2[%c10] : memref<98xf32, #tpu.memory_space<smem>>
      %176 = vector.broadcast %175 : f32 to vector<1x256xf32>
      %177 = arith.mulf %176, %116 : vector<1x256xf32>
      %178 = arith.addf %174, %177 : vector<1x256xf32>
      %c11 = arith.constant 11 : index
      %179 = memref.load %arg2[%c11] : memref<98xf32, #tpu.memory_space<smem>>
      %180 = vector.broadcast %179 : f32 to vector<1x256xf32>
      %181 = arith.mulf %180, %120 : vector<1x256xf32>
      %182 = arith.addf %178, %181 : vector<1x256xf32>
      %c12 = arith.constant 12 : index
      %183 = memref.load %arg2[%c12] : memref<98xf32, #tpu.memory_space<smem>>
      %184 = vector.broadcast %183 : f32 to vector<1x256xf32>
      %185 = arith.mulf %184, %124 : vector<1x256xf32>
      %186 = arith.addf %182, %185 : vector<1x256xf32>
      %c13 = arith.constant 13 : index
      %187 = memref.load %arg2[%c13] : memref<98xf32, #tpu.memory_space<smem>>
      %188 = vector.broadcast %187 : f32 to vector<1x256xf32>
      %189 = arith.mulf %188, %128 : vector<1x256xf32>
      %190 = arith.addf %186, %189 : vector<1x256xf32>
      %cst_56 = arith.constant 0.000000e+00 : f32
      %191 = vector.broadcast %cst_56 : f32 to vector<1x32xf32>
      %192 = vector.extract_strided_slice %190 {offsets = [0, 0], sizes = [1, 224], strides = [1, 1]} : vector<1x256xf32> to vector<1x224xf32>
      %193 = tpu.concatenate %191, %192 in 1 : vector<1x32xf32>, vector<1x224xf32> -> vector<1x256xf32>
      %194 = arith.addf %101, %193 : vector<1x256xf32>
      %cst_57 = arith.constant 0.000000e+00 : f32
      %195 = vector.broadcast %cst_57 : f32 to vector<1x256xf32>
      %c14 = arith.constant 14 : index
      %196 = memref.load %arg2[%c14] : memref<98xf32, #tpu.memory_space<smem>>
      %197 = vector.broadcast %196 : f32 to vector<1x256xf32>
      %198 = arith.mulf %197, %107 : vector<1x256xf32>
      %199 = arith.addf %195, %198 : vector<1x256xf32>
      %c15 = arith.constant 15 : index
      %200 = memref.load %arg2[%c15] : memref<98xf32, #tpu.memory_space<smem>>
      %201 = vector.broadcast %200 : f32 to vector<1x256xf32>
      %202 = arith.mulf %201, %111 : vector<1x256xf32>
      %203 = arith.addf %199, %202 : vector<1x256xf32>
      %c16 = arith.constant 16 : index
      %204 = memref.load %arg2[%c16] : memref<98xf32, #tpu.memory_space<smem>>
      %205 = vector.broadcast %204 : f32 to vector<1x256xf32>
      %206 = arith.mulf %205, %115 : vector<1x256xf32>
      %207 = arith.addf %203, %206 : vector<1x256xf32>
      %c17 = arith.constant 17 : index
      %208 = memref.load %arg2[%c17] : memref<98xf32, #tpu.memory_space<smem>>
      %209 = vector.broadcast %208 : f32 to vector<1x256xf32>
      %210 = arith.mulf %209, %116 : vector<1x256xf32>
      %211 = arith.addf %207, %210 : vector<1x256xf32>
      %c18 = arith.constant 18 : index
      %212 = memref.load %arg2[%c18] : memref<98xf32, #tpu.memory_space<smem>>
      %213 = vector.broadcast %212 : f32 to vector<1x256xf32>
      %214 = arith.mulf %213, %120 : vector<1x256xf32>
      %215 = arith.addf %211, %214 : vector<1x256xf32>
      %c19 = arith.constant 19 : index
      %216 = memref.load %arg2[%c19] : memref<98xf32, #tpu.memory_space<smem>>
      %217 = vector.broadcast %216 : f32 to vector<1x256xf32>
      %218 = arith.mulf %217, %124 : vector<1x256xf32>
      %219 = arith.addf %215, %218 : vector<1x256xf32>
      %c20 = arith.constant 20 : index
      %220 = memref.load %arg2[%c20] : memref<98xf32, #tpu.memory_space<smem>>
      %221 = vector.broadcast %220 : f32 to vector<1x256xf32>
      %222 = arith.mulf %221, %128 : vector<1x256xf32>
      %223 = arith.addf %219, %222 : vector<1x256xf32>
      %cst_58 = arith.constant 0.000000e+00 : f32
      %224 = vector.broadcast %cst_58 : f32 to vector<1x16xf32>
      %225 = vector.extract_strided_slice %223 {offsets = [0, 0], sizes = [1, 240], strides = [1, 1]} : vector<1x256xf32> to vector<1x240xf32>
      %226 = tpu.concatenate %224, %225 in 1 : vector<1x16xf32>, vector<1x240xf32> -> vector<1x256xf32>
      %227 = arith.addf %102, %226 : vector<1x256xf32>
      %cst_59 = arith.constant 0.000000e+00 : f32
      %228 = vector.broadcast %cst_59 : f32 to vector<1x256xf32>
      %c21 = arith.constant 21 : index
      %229 = memref.load %arg2[%c21] : memref<98xf32, #tpu.memory_space<smem>>
      %230 = vector.broadcast %229 : f32 to vector<1x256xf32>
      %231 = arith.mulf %230, %107 : vector<1x256xf32>
      %232 = arith.addf %228, %231 : vector<1x256xf32>
      %c22 = arith.constant 22 : index
      %233 = memref.load %arg2[%c22] : memref<98xf32, #tpu.memory_space<smem>>
      %234 = vector.broadcast %233 : f32 to vector<1x256xf32>
      %235 = arith.mulf %234, %111 : vector<1x256xf32>
      %236 = arith.addf %232, %235 : vector<1x256xf32>
      %c23 = arith.constant 23 : index
      %237 = memref.load %arg2[%c23] : memref<98xf32, #tpu.memory_space<smem>>
      %238 = vector.broadcast %237 : f32 to vector<1x256xf32>
      %239 = arith.mulf %238, %115 : vector<1x256xf32>
      %240 = arith.addf %236, %239 : vector<1x256xf32>
      %c24 = arith.constant 24 : index
      %241 = memref.load %arg2[%c24] : memref<98xf32, #tpu.memory_space<smem>>
      %242 = vector.broadcast %241 : f32 to vector<1x256xf32>
      %243 = arith.mulf %242, %116 : vector<1x256xf32>
      %244 = arith.addf %240, %243 : vector<1x256xf32>
      %c25 = arith.constant 25 : index
      %245 = memref.load %arg2[%c25] : memref<98xf32, #tpu.memory_space<smem>>
      %246 = vector.broadcast %245 : f32 to vector<1x256xf32>
      %247 = arith.mulf %246, %120 : vector<1x256xf32>
      %248 = arith.addf %244, %247 : vector<1x256xf32>
      %c26 = arith.constant 26 : index
      %249 = memref.load %arg2[%c26] : memref<98xf32, #tpu.memory_space<smem>>
      %250 = vector.broadcast %249 : f32 to vector<1x256xf32>
      %251 = arith.mulf %250, %124 : vector<1x256xf32>
      %252 = arith.addf %248, %251 : vector<1x256xf32>
      %c27 = arith.constant 27 : index
      %253 = memref.load %arg2[%c27] : memref<98xf32, #tpu.memory_space<smem>>
      %254 = vector.broadcast %253 : f32 to vector<1x256xf32>
      %255 = arith.mulf %254, %128 : vector<1x256xf32>
      %256 = arith.addf %252, %255 : vector<1x256xf32>
      %257 = arith.addf %103, %256 : vector<1x256xf32>
      %cst_60 = arith.constant 0.000000e+00 : f32
      %258 = vector.broadcast %cst_60 : f32 to vector<1x256xf32>
      %c28 = arith.constant 28 : index
      %259 = memref.load %arg2[%c28] : memref<98xf32, #tpu.memory_space<smem>>
      %260 = vector.broadcast %259 : f32 to vector<1x256xf32>
      %261 = arith.mulf %260, %107 : vector<1x256xf32>
      %262 = arith.addf %258, %261 : vector<1x256xf32>
      %c29 = arith.constant 29 : index
      %263 = memref.load %arg2[%c29] : memref<98xf32, #tpu.memory_space<smem>>
      %264 = vector.broadcast %263 : f32 to vector<1x256xf32>
      %265 = arith.mulf %264, %111 : vector<1x256xf32>
      %266 = arith.addf %262, %265 : vector<1x256xf32>
      %c30 = arith.constant 30 : index
      %267 = memref.load %arg2[%c30] : memref<98xf32, #tpu.memory_space<smem>>
      %268 = vector.broadcast %267 : f32 to vector<1x256xf32>
      %269 = arith.mulf %268, %115 : vector<1x256xf32>
      %270 = arith.addf %266, %269 : vector<1x256xf32>
      %c31 = arith.constant 31 : index
      %271 = memref.load %arg2[%c31] : memref<98xf32, #tpu.memory_space<smem>>
      %272 = vector.broadcast %271 : f32 to vector<1x256xf32>
      %273 = arith.mulf %272, %116 : vector<1x256xf32>
      %274 = arith.addf %270, %273 : vector<1x256xf32>
      %c32 = arith.constant 32 : index
      %275 = memref.load %arg2[%c32] : memref<98xf32, #tpu.memory_space<smem>>
      %276 = vector.broadcast %275 : f32 to vector<1x256xf32>
      %277 = arith.mulf %276, %120 : vector<1x256xf32>
      %278 = arith.addf %274, %277 : vector<1x256xf32>
      %c33 = arith.constant 33 : index
      %279 = memref.load %arg2[%c33] : memref<98xf32, #tpu.memory_space<smem>>
      %280 = vector.broadcast %279 : f32 to vector<1x256xf32>
      %281 = arith.mulf %280, %124 : vector<1x256xf32>
      %282 = arith.addf %278, %281 : vector<1x256xf32>
      %c34 = arith.constant 34 : index
      %283 = memref.load %arg2[%c34] : memref<98xf32, #tpu.memory_space<smem>>
      %284 = vector.broadcast %283 : f32 to vector<1x256xf32>
      %285 = arith.mulf %284, %128 : vector<1x256xf32>
      %286 = arith.addf %282, %285 : vector<1x256xf32>
      %287 = vector.extract_strided_slice %286 {offsets = [0, 16], sizes = [1, 240], strides = [1, 1]} : vector<1x256xf32> to vector<1x240xf32>
      %cst_61 = arith.constant 0.000000e+00 : f32
      %288 = vector.broadcast %cst_61 : f32 to vector<1x16xf32>
      %289 = tpu.concatenate %287, %288 in 1 : vector<1x240xf32>, vector<1x16xf32> -> vector<1x256xf32>
      %290 = arith.addf %161, %289 : vector<1x256xf32>
      %cst_62 = arith.constant 0.000000e+00 : f32
      %291 = vector.broadcast %cst_62 : f32 to vector<1x256xf32>
      %c35 = arith.constant 35 : index
      %292 = memref.load %arg2[%c35] : memref<98xf32, #tpu.memory_space<smem>>
      %293 = vector.broadcast %292 : f32 to vector<1x256xf32>
      %294 = arith.mulf %293, %107 : vector<1x256xf32>
      %295 = arith.addf %291, %294 : vector<1x256xf32>
      %c36 = arith.constant 36 : index
      %296 = memref.load %arg2[%c36] : memref<98xf32, #tpu.memory_space<smem>>
      %297 = vector.broadcast %296 : f32 to vector<1x256xf32>
      %298 = arith.mulf %297, %111 : vector<1x256xf32>
      %299 = arith.addf %295, %298 : vector<1x256xf32>
      %c37 = arith.constant 37 : index
      %300 = memref.load %arg2[%c37] : memref<98xf32, #tpu.memory_space<smem>>
      %301 = vector.broadcast %300 : f32 to vector<1x256xf32>
      %302 = arith.mulf %301, %115 : vector<1x256xf32>
      %303 = arith.addf %299, %302 : vector<1x256xf32>
      %c38 = arith.constant 38 : index
      %304 = memref.load %arg2[%c38] : memref<98xf32, #tpu.memory_space<smem>>
      %305 = vector.broadcast %304 : f32 to vector<1x256xf32>
      %306 = arith.mulf %305, %116 : vector<1x256xf32>
      %307 = arith.addf %303, %306 : vector<1x256xf32>
      %c39 = arith.constant 39 : index
      %308 = memref.load %arg2[%c39] : memref<98xf32, #tpu.memory_space<smem>>
      %309 = vector.broadcast %308 : f32 to vector<1x256xf32>
      %310 = arith.mulf %309, %120 : vector<1x256xf32>
      %311 = arith.addf %307, %310 : vector<1x256xf32>
      %c40 = arith.constant 40 : index
      %312 = memref.load %arg2[%c40] : memref<98xf32, #tpu.memory_space<smem>>
      %313 = vector.broadcast %312 : f32 to vector<1x256xf32>
      %314 = arith.mulf %313, %124 : vector<1x256xf32>
      %315 = arith.addf %311, %314 : vector<1x256xf32>
      %c41 = arith.constant 41 : index
      %316 = memref.load %arg2[%c41] : memref<98xf32, #tpu.memory_space<smem>>
      %317 = vector.broadcast %316 : f32 to vector<1x256xf32>
      %318 = arith.mulf %317, %128 : vector<1x256xf32>
      %319 = arith.addf %315, %318 : vector<1x256xf32>
      %320 = vector.extract_strided_slice %319 {offsets = [0, 32], sizes = [1, 224], strides = [1, 1]} : vector<1x256xf32> to vector<1x224xf32>
      %cst_63 = arith.constant 0.000000e+00 : f32
      %321 = vector.broadcast %cst_63 : f32 to vector<1x32xf32>
      %322 = tpu.concatenate %320, %321 in 1 : vector<1x224xf32>, vector<1x32xf32> -> vector<1x256xf32>
      %323 = arith.addf %194, %322 : vector<1x256xf32>
      %cst_64 = arith.constant 0.000000e+00 : f32
      %324 = vector.broadcast %cst_64 : f32 to vector<1x256xf32>
      %c42 = arith.constant 42 : index
      %325 = memref.load %arg2[%c42] : memref<98xf32, #tpu.memory_space<smem>>
      %326 = vector.broadcast %325 : f32 to vector<1x256xf32>
      %327 = arith.mulf %326, %107 : vector<1x256xf32>
      %328 = arith.addf %324, %327 : vector<1x256xf32>
      %c43 = arith.constant 43 : index
      %329 = memref.load %arg2[%c43] : memref<98xf32, #tpu.memory_space<smem>>
      %330 = vector.broadcast %329 : f32 to vector<1x256xf32>
      %331 = arith.mulf %330, %111 : vector<1x256xf32>
      %332 = arith.addf %328, %331 : vector<1x256xf32>
      %c44 = arith.constant 44 : index
      %333 = memref.load %arg2[%c44] : memref<98xf32, #tpu.memory_space<smem>>
      %334 = vector.broadcast %333 : f32 to vector<1x256xf32>
      %335 = arith.mulf %334, %115 : vector<1x256xf32>
      %336 = arith.addf %332, %335 : vector<1x256xf32>
      %c45 = arith.constant 45 : index
      %337 = memref.load %arg2[%c45] : memref<98xf32, #tpu.memory_space<smem>>
      %338 = vector.broadcast %337 : f32 to vector<1x256xf32>
      %339 = arith.mulf %338, %116 : vector<1x256xf32>
      %340 = arith.addf %336, %339 : vector<1x256xf32>
      %c46 = arith.constant 46 : index
      %341 = memref.load %arg2[%c46] : memref<98xf32, #tpu.memory_space<smem>>
      %342 = vector.broadcast %341 : f32 to vector<1x256xf32>
      %343 = arith.mulf %342, %120 : vector<1x256xf32>
      %344 = arith.addf %340, %343 : vector<1x256xf32>
      %c47 = arith.constant 47 : index
      %345 = memref.load %arg2[%c47] : memref<98xf32, #tpu.memory_space<smem>>
      %346 = vector.broadcast %345 : f32 to vector<1x256xf32>
      %347 = arith.mulf %346, %124 : vector<1x256xf32>
      %348 = arith.addf %344, %347 : vector<1x256xf32>
      %c48 = arith.constant 48 : index
      %349 = memref.load %arg2[%c48] : memref<98xf32, #tpu.memory_space<smem>>
      %350 = vector.broadcast %349 : f32 to vector<1x256xf32>
      %351 = arith.mulf %350, %128 : vector<1x256xf32>
      %352 = arith.addf %348, %351 : vector<1x256xf32>
      %353 = vector.extract_strided_slice %352 {offsets = [0, 48], sizes = [1, 208], strides = [1, 1]} : vector<1x256xf32> to vector<1x208xf32>
      %cst_65 = arith.constant 0.000000e+00 : f32
      %354 = vector.broadcast %cst_65 : f32 to vector<1x48xf32>
      %355 = tpu.concatenate %353, %354 in 1 : vector<1x208xf32>, vector<1x48xf32> -> vector<1x256xf32>
      %356 = arith.addf %227, %355 : vector<1x256xf32>
      %cst_66 = arith.constant 0.000000e+00 : f32
      %357 = vector.broadcast %cst_66 : f32 to vector<1x3xf32>
      %358 = vector.extract_strided_slice %21 {offsets = [0, 0], sizes = [1, 253], strides = [1, 1]} : vector<1x256xf32> to vector<1x253xf32>
      %359 = tpu.concatenate %357, %358 in 1 : vector<1x3xf32>, vector<1x253xf32> -> vector<1x256xf32>
      %360 = arith.mulf %359, %33 : vector<1x256xf32>
      %cst_67 = arith.constant 0.000000e+00 : f32
      %361 = vector.broadcast %cst_67 : f32 to vector<1x2xf32>
      %362 = vector.extract_strided_slice %21 {offsets = [0, 0], sizes = [1, 254], strides = [1, 1]} : vector<1x256xf32> to vector<1x254xf32>
      %363 = tpu.concatenate %361, %362 in 1 : vector<1x2xf32>, vector<1x254xf32> -> vector<1x256xf32>
      %364 = arith.mulf %363, %44 : vector<1x256xf32>
      %cst_68 = arith.constant 0.000000e+00 : f32
      %365 = vector.broadcast %cst_68 : f32 to vector<1x1xf32>
      %366 = vector.extract_strided_slice %21 {offsets = [0, 0], sizes = [1, 255], strides = [1, 1]} : vector<1x256xf32> to vector<1x255xf32>
      %367 = tpu.concatenate %365, %366 in 1 : vector<1x1xf32>, vector<1x255xf32> -> vector<1x256xf32>
      %368 = arith.mulf %367, %55 : vector<1x256xf32>
      %369 = arith.mulf %21, %66 : vector<1x256xf32>
      %370 = vector.extract_strided_slice %21 {offsets = [0, 1], sizes = [1, 255], strides = [1, 1]} : vector<1x256xf32> to vector<1x255xf32>
      %cst_69 = arith.constant 0.000000e+00 : f32
      %371 = vector.broadcast %cst_69 : f32 to vector<1x1xf32>
      %372 = tpu.concatenate %370, %371 in 1 : vector<1x255xf32>, vector<1x1xf32> -> vector<1x256xf32>
      %373 = arith.mulf %372, %77 : vector<1x256xf32>
      %374 = vector.extract_strided_slice %21 {offsets = [0, 2], sizes = [1, 254], strides = [1, 1]} : vector<1x256xf32> to vector<1x254xf32>
      %cst_70 = arith.constant 0.000000e+00 : f32
      %375 = vector.broadcast %cst_70 : f32 to vector<1x2xf32>
      %376 = tpu.concatenate %374, %375 in 1 : vector<1x254xf32>, vector<1x2xf32> -> vector<1x256xf32>
      %377 = arith.mulf %376, %88 : vector<1x256xf32>
      %378 = vector.extract_strided_slice %21 {offsets = [0, 3], sizes = [1, 253], strides = [1, 1]} : vector<1x256xf32> to vector<1x253xf32>
      %cst_71 = arith.constant 0.000000e+00 : f32
      %379 = vector.broadcast %cst_71 : f32 to vector<1x3xf32>
      %380 = tpu.concatenate %378, %379 in 1 : vector<1x253xf32>, vector<1x3xf32> -> vector<1x256xf32>
      %381 = arith.mulf %380, %99 : vector<1x256xf32>
      %cst_72 = arith.constant 0.000000e+00 : f32
      %382 = vector.broadcast %cst_72 : f32 to vector<1x256xf32>
      %c49 = arith.constant 49 : index
      %383 = memref.load %arg2[%c49] : memref<98xf32, #tpu.memory_space<smem>>
      %384 = vector.broadcast %383 : f32 to vector<1x256xf32>
      %385 = arith.mulf %384, %360 : vector<1x256xf32>
      %386 = arith.addf %382, %385 : vector<1x256xf32>
      %c50 = arith.constant 50 : index
      %387 = memref.load %arg2[%c50] : memref<98xf32, #tpu.memory_space<smem>>
      %388 = vector.broadcast %387 : f32 to vector<1x256xf32>
      %389 = arith.mulf %388, %364 : vector<1x256xf32>
      %390 = arith.addf %386, %389 : vector<1x256xf32>
      %c51 = arith.constant 51 : index
      %391 = memref.load %arg2[%c51] : memref<98xf32, #tpu.memory_space<smem>>
      %392 = vector.broadcast %391 : f32 to vector<1x256xf32>
      %393 = arith.mulf %392, %368 : vector<1x256xf32>
      %394 = arith.addf %390, %393 : vector<1x256xf32>
      %c52 = arith.constant 52 : index
      %395 = memref.load %arg2[%c52] : memref<98xf32, #tpu.memory_space<smem>>
      %396 = vector.broadcast %395 : f32 to vector<1x256xf32>
      %397 = arith.mulf %396, %369 : vector<1x256xf32>
      %398 = arith.addf %394, %397 : vector<1x256xf32>
      %c53 = arith.constant 53 : index
      %399 = memref.load %arg2[%c53] : memref<98xf32, #tpu.memory_space<smem>>
      %400 = vector.broadcast %399 : f32 to vector<1x256xf32>
      %401 = arith.mulf %400, %373 : vector<1x256xf32>
      %402 = arith.addf %398, %401 : vector<1x256xf32>
      %c54 = arith.constant 54 : index
      %403 = memref.load %arg2[%c54] : memref<98xf32, #tpu.memory_space<smem>>
      %404 = vector.broadcast %403 : f32 to vector<1x256xf32>
      %405 = arith.mulf %404, %377 : vector<1x256xf32>
      %406 = arith.addf %402, %405 : vector<1x256xf32>
      %c55 = arith.constant 55 : index
      %407 = memref.load %arg2[%c55] : memref<98xf32, #tpu.memory_space<smem>>
      %408 = vector.broadcast %407 : f32 to vector<1x256xf32>
      %409 = arith.mulf %408, %381 : vector<1x256xf32>
      %410 = arith.addf %406, %409 : vector<1x256xf32>
      %cst_73 = arith.constant 0.000000e+00 : f32
      %411 = vector.broadcast %cst_73 : f32 to vector<1x48xf32>
      %412 = vector.extract_strided_slice %410 {offsets = [0, 0], sizes = [1, 208], strides = [1, 1]} : vector<1x256xf32> to vector<1x208xf32>
      %413 = tpu.concatenate %411, %412 in 1 : vector<1x48xf32>, vector<1x208xf32> -> vector<1x256xf32>
      %414 = arith.addf %257, %413 : vector<1x256xf32>
      %cst_74 = arith.constant 0.000000e+00 : f32
      %415 = vector.broadcast %cst_74 : f32 to vector<1x256xf32>
      %c56 = arith.constant 56 : index
      %416 = memref.load %arg2[%c56] : memref<98xf32, #tpu.memory_space<smem>>
      %417 = vector.broadcast %416 : f32 to vector<1x256xf32>
      %418 = arith.mulf %417, %360 : vector<1x256xf32>
      %419 = arith.addf %415, %418 : vector<1x256xf32>
      %c57 = arith.constant 57 : index
      %420 = memref.load %arg2[%c57] : memref<98xf32, #tpu.memory_space<smem>>
      %421 = vector.broadcast %420 : f32 to vector<1x256xf32>
      %422 = arith.mulf %421, %364 : vector<1x256xf32>
      %423 = arith.addf %419, %422 : vector<1x256xf32>
      %c58 = arith.constant 58 : index
      %424 = memref.load %arg2[%c58] : memref<98xf32, #tpu.memory_space<smem>>
      %425 = vector.broadcast %424 : f32 to vector<1x256xf32>
      %426 = arith.mulf %425, %368 : vector<1x256xf32>
      %427 = arith.addf %423, %426 : vector<1x256xf32>
      %c59 = arith.constant 59 : index
      %428 = memref.load %arg2[%c59] : memref<98xf32, #tpu.memory_space<smem>>
      %429 = vector.broadcast %428 : f32 to vector<1x256xf32>
      %430 = arith.mulf %429, %369 : vector<1x256xf32>
      %431 = arith.addf %427, %430 : vector<1x256xf32>
      %c60 = arith.constant 60 : index
      %432 = memref.load %arg2[%c60] : memref<98xf32, #tpu.memory_space<smem>>
      %433 = vector.broadcast %432 : f32 to vector<1x256xf32>
      %434 = arith.mulf %433, %373 : vector<1x256xf32>
      %435 = arith.addf %431, %434 : vector<1x256xf32>
      %c61 = arith.constant 61 : index
      %436 = memref.load %arg2[%c61] : memref<98xf32, #tpu.memory_space<smem>>
      %437 = vector.broadcast %436 : f32 to vector<1x256xf32>
      %438 = arith.mulf %437, %377 : vector<1x256xf32>
      %439 = arith.addf %435, %438 : vector<1x256xf32>
      %c62 = arith.constant 62 : index
      %440 = memref.load %arg2[%c62] : memref<98xf32, #tpu.memory_space<smem>>
      %441 = vector.broadcast %440 : f32 to vector<1x256xf32>
      %442 = arith.mulf %441, %381 : vector<1x256xf32>
      %443 = arith.addf %439, %442 : vector<1x256xf32>
      %cst_75 = arith.constant 0.000000e+00 : f32
      %444 = vector.broadcast %cst_75 : f32 to vector<1x32xf32>
      %445 = vector.extract_strided_slice %443 {offsets = [0, 0], sizes = [1, 224], strides = [1, 1]} : vector<1x256xf32> to vector<1x224xf32>
      %446 = tpu.concatenate %444, %445 in 1 : vector<1x32xf32>, vector<1x224xf32> -> vector<1x256xf32>
      %447 = arith.addf %290, %446 : vector<1x256xf32>
      %cst_76 = arith.constant 0.000000e+00 : f32
      %448 = vector.broadcast %cst_76 : f32 to vector<1x256xf32>
      %c63 = arith.constant 63 : index
      %449 = memref.load %arg2[%c63] : memref<98xf32, #tpu.memory_space<smem>>
      %450 = vector.broadcast %449 : f32 to vector<1x256xf32>
      %451 = arith.mulf %450, %360 : vector<1x256xf32>
      %452 = arith.addf %448, %451 : vector<1x256xf32>
      %c64 = arith.constant 64 : index
      %453 = memref.load %arg2[%c64] : memref<98xf32, #tpu.memory_space<smem>>
      %454 = vector.broadcast %453 : f32 to vector<1x256xf32>
      %455 = arith.mulf %454, %364 : vector<1x256xf32>
      %456 = arith.addf %452, %455 : vector<1x256xf32>
      %c65 = arith.constant 65 : index
      %457 = memref.load %arg2[%c65] : memref<98xf32, #tpu.memory_space<smem>>
      %458 = vector.broadcast %457 : f32 to vector<1x256xf32>
      %459 = arith.mulf %458, %368 : vector<1x256xf32>
      %460 = arith.addf %456, %459 : vector<1x256xf32>
      %c66 = arith.constant 66 : index
      %461 = memref.load %arg2[%c66] : memref<98xf32, #tpu.memory_space<smem>>
      %462 = vector.broadcast %461 : f32 to vector<1x256xf32>
      %463 = arith.mulf %462, %369 : vector<1x256xf32>
      %464 = arith.addf %460, %463 : vector<1x256xf32>
      %c67 = arith.constant 67 : index
      %465 = memref.load %arg2[%c67] : memref<98xf32, #tpu.memory_space<smem>>
      %466 = vector.broadcast %465 : f32 to vector<1x256xf32>
      %467 = arith.mulf %466, %373 : vector<1x256xf32>
      %468 = arith.addf %464, %467 : vector<1x256xf32>
      %c68 = arith.constant 68 : index
      %469 = memref.load %arg2[%c68] : memref<98xf32, #tpu.memory_space<smem>>
      %470 = vector.broadcast %469 : f32 to vector<1x256xf32>
      %471 = arith.mulf %470, %377 : vector<1x256xf32>
      %472 = arith.addf %468, %471 : vector<1x256xf32>
      %c69 = arith.constant 69 : index
      %473 = memref.load %arg2[%c69] : memref<98xf32, #tpu.memory_space<smem>>
      %474 = vector.broadcast %473 : f32 to vector<1x256xf32>
      %475 = arith.mulf %474, %381 : vector<1x256xf32>
      %476 = arith.addf %472, %475 : vector<1x256xf32>
      %cst_77 = arith.constant 0.000000e+00 : f32
      %477 = vector.broadcast %cst_77 : f32 to vector<1x16xf32>
      %478 = vector.extract_strided_slice %476 {offsets = [0, 0], sizes = [1, 240], strides = [1, 1]} : vector<1x256xf32> to vector<1x240xf32>
      %479 = tpu.concatenate %477, %478 in 1 : vector<1x16xf32>, vector<1x240xf32> -> vector<1x256xf32>
      %480 = arith.addf %323, %479 : vector<1x256xf32>
      %cst_78 = arith.constant 0.000000e+00 : f32
      %481 = vector.broadcast %cst_78 : f32 to vector<1x256xf32>
      %c70 = arith.constant 70 : index
      %482 = memref.load %arg2[%c70] : memref<98xf32, #tpu.memory_space<smem>>
      %483 = vector.broadcast %482 : f32 to vector<1x256xf32>
      %484 = arith.mulf %483, %360 : vector<1x256xf32>
      %485 = arith.addf %481, %484 : vector<1x256xf32>
      %c71 = arith.constant 71 : index
      %486 = memref.load %arg2[%c71] : memref<98xf32, #tpu.memory_space<smem>>
      %487 = vector.broadcast %486 : f32 to vector<1x256xf32>
      %488 = arith.mulf %487, %364 : vector<1x256xf32>
      %489 = arith.addf %485, %488 : vector<1x256xf32>
      %c72 = arith.constant 72 : index
      %490 = memref.load %arg2[%c72] : memref<98xf32, #tpu.memory_space<smem>>
      %491 = vector.broadcast %490 : f32 to vector<1x256xf32>
      %492 = arith.mulf %491, %368 : vector<1x256xf32>
      %493 = arith.addf %489, %492 : vector<1x256xf32>
      %c73 = arith.constant 73 : index
      %494 = memref.load %arg2[%c73] : memref<98xf32, #tpu.memory_space<smem>>
      %495 = vector.broadcast %494 : f32 to vector<1x256xf32>
      %496 = arith.mulf %495, %369 : vector<1x256xf32>
      %497 = arith.addf %493, %496 : vector<1x256xf32>
      %c74 = arith.constant 74 : index
      %498 = memref.load %arg2[%c74] : memref<98xf32, #tpu.memory_space<smem>>
      %499 = vector.broadcast %498 : f32 to vector<1x256xf32>
      %500 = arith.mulf %499, %373 : vector<1x256xf32>
      %501 = arith.addf %497, %500 : vector<1x256xf32>
      %c75 = arith.constant 75 : index
      %502 = memref.load %arg2[%c75] : memref<98xf32, #tpu.memory_space<smem>>
      %503 = vector.broadcast %502 : f32 to vector<1x256xf32>
      %504 = arith.mulf %503, %377 : vector<1x256xf32>
      %505 = arith.addf %501, %504 : vector<1x256xf32>
      %c76 = arith.constant 76 : index
      %506 = memref.load %arg2[%c76] : memref<98xf32, #tpu.memory_space<smem>>
      %507 = vector.broadcast %506 : f32 to vector<1x256xf32>
      %508 = arith.mulf %507, %381 : vector<1x256xf32>
      %509 = arith.addf %505, %508 : vector<1x256xf32>
      %510 = arith.addf %356, %509 : vector<1x256xf32>
      %cst_79 = arith.constant 0.000000e+00 : f32
      %511 = vector.broadcast %cst_79 : f32 to vector<1x256xf32>
      %c77 = arith.constant 77 : index
      %512 = memref.load %arg2[%c77] : memref<98xf32, #tpu.memory_space<smem>>
      %513 = vector.broadcast %512 : f32 to vector<1x256xf32>
      %514 = arith.mulf %513, %360 : vector<1x256xf32>
      %515 = arith.addf %511, %514 : vector<1x256xf32>
      %c78 = arith.constant 78 : index
      %516 = memref.load %arg2[%c78] : memref<98xf32, #tpu.memory_space<smem>>
      %517 = vector.broadcast %516 : f32 to vector<1x256xf32>
      %518 = arith.mulf %517, %364 : vector<1x256xf32>
      %519 = arith.addf %515, %518 : vector<1x256xf32>
      %c79 = arith.constant 79 : index
      %520 = memref.load %arg2[%c79] : memref<98xf32, #tpu.memory_space<smem>>
      %521 = vector.broadcast %520 : f32 to vector<1x256xf32>
      %522 = arith.mulf %521, %368 : vector<1x256xf32>
      %523 = arith.addf %519, %522 : vector<1x256xf32>
      %c80 = arith.constant 80 : index
      %524 = memref.load %arg2[%c80] : memref<98xf32, #tpu.memory_space<smem>>
      %525 = vector.broadcast %524 : f32 to vector<1x256xf32>
      %526 = arith.mulf %525, %369 : vector<1x256xf32>
      %527 = arith.addf %523, %526 : vector<1x256xf32>
      %c81 = arith.constant 81 : index
      %528 = memref.load %arg2[%c81] : memref<98xf32, #tpu.memory_space<smem>>
      %529 = vector.broadcast %528 : f32 to vector<1x256xf32>
      %530 = arith.mulf %529, %373 : vector<1x256xf32>
      %531 = arith.addf %527, %530 : vector<1x256xf32>
      %c82 = arith.constant 82 : index
      %532 = memref.load %arg2[%c82] : memref<98xf32, #tpu.memory_space<smem>>
      %533 = vector.broadcast %532 : f32 to vector<1x256xf32>
      %534 = arith.mulf %533, %377 : vector<1x256xf32>
      %535 = arith.addf %531, %534 : vector<1x256xf32>
      %c83 = arith.constant 83 : index
      %536 = memref.load %arg2[%c83] : memref<98xf32, #tpu.memory_space<smem>>
      %537 = vector.broadcast %536 : f32 to vector<1x256xf32>
      %538 = arith.mulf %537, %381 : vector<1x256xf32>
      %539 = arith.addf %535, %538 : vector<1x256xf32>
      %540 = vector.extract_strided_slice %539 {offsets = [0, 16], sizes = [1, 240], strides = [1, 1]} : vector<1x256xf32> to vector<1x240xf32>
      %cst_80 = arith.constant 0.000000e+00 : f32
      %541 = vector.broadcast %cst_80 : f32 to vector<1x16xf32>
      %542 = tpu.concatenate %540, %541 in 1 : vector<1x240xf32>, vector<1x16xf32> -> vector<1x256xf32>
      %543 = arith.addf %414, %542 : vector<1x256xf32>
      %cst_81 = arith.constant 0.000000e+00 : f32
      %544 = vector.broadcast %cst_81 : f32 to vector<1x256xf32>
      %c84 = arith.constant 84 : index
      %545 = memref.load %arg2[%c84] : memref<98xf32, #tpu.memory_space<smem>>
      %546 = vector.broadcast %545 : f32 to vector<1x256xf32>
      %547 = arith.mulf %546, %360 : vector<1x256xf32>
      %548 = arith.addf %544, %547 : vector<1x256xf32>
      %c85 = arith.constant 85 : index
      %549 = memref.load %arg2[%c85] : memref<98xf32, #tpu.memory_space<smem>>
      %550 = vector.broadcast %549 : f32 to vector<1x256xf32>
      %551 = arith.mulf %550, %364 : vector<1x256xf32>
      %552 = arith.addf %548, %551 : vector<1x256xf32>
      %c86 = arith.constant 86 : index
      %553 = memref.load %arg2[%c86] : memref<98xf32, #tpu.memory_space<smem>>
      %554 = vector.broadcast %553 : f32 to vector<1x256xf32>
      %555 = arith.mulf %554, %368 : vector<1x256xf32>
      %556 = arith.addf %552, %555 : vector<1x256xf32>
      %c87 = arith.constant 87 : index
      %557 = memref.load %arg2[%c87] : memref<98xf32, #tpu.memory_space<smem>>
      %558 = vector.broadcast %557 : f32 to vector<1x256xf32>
      %559 = arith.mulf %558, %369 : vector<1x256xf32>
      %560 = arith.addf %556, %559 : vector<1x256xf32>
      %c88 = arith.constant 88 : index
      %561 = memref.load %arg2[%c88] : memref<98xf32, #tpu.memory_space<smem>>
      %562 = vector.broadcast %561 : f32 to vector<1x256xf32>
      %563 = arith.mulf %562, %373 : vector<1x256xf32>
      %564 = arith.addf %560, %563 : vector<1x256xf32>
      %c89 = arith.constant 89 : index
      %565 = memref.load %arg2[%c89] : memref<98xf32, #tpu.memory_space<smem>>
      %566 = vector.broadcast %565 : f32 to vector<1x256xf32>
      %567 = arith.mulf %566, %377 : vector<1x256xf32>
      %568 = arith.addf %564, %567 : vector<1x256xf32>
      %c90 = arith.constant 90 : index
      %569 = memref.load %arg2[%c90] : memref<98xf32, #tpu.memory_space<smem>>
      %570 = vector.broadcast %569 : f32 to vector<1x256xf32>
      %571 = arith.mulf %570, %381 : vector<1x256xf32>
      %572 = arith.addf %568, %571 : vector<1x256xf32>
      %573 = vector.extract_strided_slice %572 {offsets = [0, 32], sizes = [1, 224], strides = [1, 1]} : vector<1x256xf32> to vector<1x224xf32>
      %cst_82 = arith.constant 0.000000e+00 : f32
      %574 = vector.broadcast %cst_82 : f32 to vector<1x32xf32>
      %575 = tpu.concatenate %573, %574 in 1 : vector<1x224xf32>, vector<1x32xf32> -> vector<1x256xf32>
      %576 = arith.addf %447, %575 : vector<1x256xf32>
      %cst_83 = arith.constant 0.000000e+00 : f32
      %577 = vector.broadcast %cst_83 : f32 to vector<1x256xf32>
      %c91 = arith.constant 91 : index
      %578 = memref.load %arg2[%c91] : memref<98xf32, #tpu.memory_space<smem>>
      %579 = vector.broadcast %578 : f32 to vector<1x256xf32>
      %580 = arith.mulf %579, %360 : vector<1x256xf32>
      %581 = arith.addf %577, %580 : vector<1x256xf32>
      %c92 = arith.constant 92 : index
      %582 = memref.load %arg2[%c92] : memref<98xf32, #tpu.memory_space<smem>>
      %583 = vector.broadcast %582 : f32 to vector<1x256xf32>
      %584 = arith.mulf %583, %364 : vector<1x256xf32>
      %585 = arith.addf %581, %584 : vector<1x256xf32>
      %c93 = arith.constant 93 : index
      %586 = memref.load %arg2[%c93] : memref<98xf32, #tpu.memory_space<smem>>
      %587 = vector.broadcast %586 : f32 to vector<1x256xf32>
      %588 = arith.mulf %587, %368 : vector<1x256xf32>
      %589 = arith.addf %585, %588 : vector<1x256xf32>
      %c94 = arith.constant 94 : index
      %590 = memref.load %arg2[%c94] : memref<98xf32, #tpu.memory_space<smem>>
      %591 = vector.broadcast %590 : f32 to vector<1x256xf32>
      %592 = arith.mulf %591, %369 : vector<1x256xf32>
      %593 = arith.addf %589, %592 : vector<1x256xf32>
      %c95 = arith.constant 95 : index
      %594 = memref.load %arg2[%c95] : memref<98xf32, #tpu.memory_space<smem>>
      %595 = vector.broadcast %594 : f32 to vector<1x256xf32>
      %596 = arith.mulf %595, %373 : vector<1x256xf32>
      %597 = arith.addf %593, %596 : vector<1x256xf32>
      %c96 = arith.constant 96 : index
      %598 = memref.load %arg2[%c96] : memref<98xf32, #tpu.memory_space<smem>>
      %599 = vector.broadcast %598 : f32 to vector<1x256xf32>
      %600 = arith.mulf %599, %377 : vector<1x256xf32>
      %601 = arith.addf %597, %600 : vector<1x256xf32>
      %c97 = arith.constant 97 : index
      %602 = memref.load %arg2[%c97] : memref<98xf32, #tpu.memory_space<smem>>
      %603 = vector.broadcast %602 : f32 to vector<1x256xf32>
      %604 = arith.mulf %603, %381 : vector<1x256xf32>
      %605 = arith.addf %601, %604 : vector<1x256xf32>
      %606 = vector.extract_strided_slice %605 {offsets = [0, 48], sizes = [1, 208], strides = [1, 1]} : vector<1x256xf32> to vector<1x208xf32>
      %cst_84 = arith.constant 0.000000e+00 : f32
      %607 = vector.broadcast %cst_84 : f32 to vector<1x48xf32>
      %608 = tpu.concatenate %606, %607 in 1 : vector<1x208xf32>, vector<1x48xf32> -> vector<1x256xf32>
      %609 = arith.addf %480, %608 : vector<1x256xf32>
      %610 = arith.addf %576, %609 : vector<1x256xf32>
      %611 = arith.addf %510, %543 : vector<1x256xf32>
      %612 = arith.addf %610, %611 : vector<1x256xf32>
      %613 = arith.negf %612 : vector<1x256xf32>
      %614 = math.exp %613 : vector<1x256xf32>
      %cst_85 = arith.constant 1.000000e+00 : f32
      %615 = vector.broadcast %cst_85 : f32 to vector<1x256xf32>
      %616 = arith.addf %615, %614 : vector<1x256xf32>
      %617 = arith.divf %615, %616 : vector<1x256xf32>
      %c0_86 = arith.constant 0 : index
      %c0_87 = arith.constant 0 : index
      %c0_88 = arith.constant 0 : index
      %618 = vector.load %arg5[%c0_86, %c0_87, %c0_88] : memref<1x1x256xf32, #tpu.memory_space<vmem>>, vector<1x1x256xf32>
      %619 = vector.shape_cast %618 : vector<1x1x256xf32> to vector<1x256xf32>
      %620 = vector.shape_cast %617 : vector<1x256xf32> to vector<1x1x256xf32>
      tpu.vector_store %arg5[%c0_86, %c0_87, %c0_88], %620 {strides = array<i32>} : memref<1x1x256xf32, #tpu.memory_space<vmem>>, vector<1x1x256xf32>,
    } else {
    }
    return
  }
  func.func @transform_0(%arg0: i32, %arg1: i32) -> i32 {
    %c0_i32 = arith.constant 0 : i32
    %c0_i32_0 = arith.constant 0 : i32
    return %c0_i32 : i32
  }
  func.func @transform_1(%arg0: i32, %arg1: i32) -> (i32, i32) {
    %c0_i32 = arith.constant 0 : i32
    %c0_i32_0 = arith.constant 0 : i32
    %c0_i32_1 = arith.constant 0 : i32
    return %c0_i32, %c0_i32_0 : i32, i32
  }
  func.func @transform_2(%arg0: i32, %arg1: i32) -> (i32, i32, i32) {
    %c0_i32 = arith.constant 0 : i32
    %c0_i32_0 = arith.constant 0 : i32
    return %arg0, %arg1, %c0_i32 : i32, i32, i32
  }
  func.func @transform_3(%arg0: i32, %arg1: i32) -> (i32, i32, i32) {
    %c0_i32 = arith.constant 0 : i32
    %c0_i32_0 = arith.constant 0 : i32
    %c0_i32_1 = arith.constant 0 : i32
    return %arg0, %c0_i32, %c0_i32_0 : i32, i32, i32
  }
}

</mosaic_0001>

<bundles_post_ra>
// kernel: tpu_custom_call.1
= control target key start
LH: loop header
LB: loop body
LE: loop exit
PB: predicated region body
PF: predicated region fallthrough
CT: control target
= control target key end

     0   :  { %s3235_s0 = inlined_call_operand.hbm [shape: f32[98], index: 0, kind: input, shape index: {}]   ;;  %s3236_s1 = inlined_call_operand.hbm [shape: s32[1,256], index: 1, kind: input, shape index: {}]   ;;  %s3237_s2 = inlined_call_operand.hbm [shape: f32[2,4,256], index: 2, kind: input, shape index: {}]   ;;  %s3238_s3 = inlined_call_operand.hbm [shape: f32[2,1,256], index: 3, kind: output, shape index: {}]  }
   0x1   :  { %3267 = sst [smem:[#allocation29_spill]] %s3235_s0 }
   0x2   :  { %3268 = sst [smem:[#allocation30_spill]] %s3236_s1 }
   0x3   :  { %3269 = sst [smem:[#allocation31_spill]] %s3237_s2 }
   0x4   :  { %8 = vsyncpa [#allocation7], 0 }
   0x5   :  { %9 = vsyncpa [#allocation5], 0 }
   0x6   :  { %10 = vsyncpa [#allocation10], 0 }
   0x7   :  { %12 = vsyncpa [#allocation10 + $0x1], 0 }
   0x8   :  { %13 = vsyncpa [#allocation6], 0 }
   0x9   :  { %15 = vsyncpa [#allocation6 + $0x1], 0  ;;  %s1920_s12 = smov 0   ;;  %s1922_s13 = smov 0  }
   0xa   :  { %s1924_s14 = smov 0   ;;  %s1926_s15 = smov 0  }
   0xb   :  { %s1928_s16 = smov 0   ;;  %s1930_s17 = smov 0  }
   0xc LB: > { %3270 = sst [smem:[#allocation16_spill]] %s1866_s13  ;;  %s1487_s18 = sadd.s32 4294967295, %s1882_s17   ;;  %s1882_s17 = sphi %s1930_s17, %s21_s17   ;;  %s1878_s16 = sphi %s1928_s16, %s3381_s16   ;;  %s1874_s15 = sphi %s1926_s15, %s3380_s15   ;;  %s1870_s14 = sphi %s1924_s14, %s3379_s14   ;;  %s1866_s13 = sphi %s1922_s13, %s3378_s13   ;;  %s1862_s12 = sphi %s1920_s12, %s3377_s12  }
   0xd   : > { %3271 = sst [smem:[#allocation17_spill]] %s1870_s14  ;;  %s1488_s19 = sadd.s32 4294967294, %s1882_s17  }
   0xe   : > { %3272 = sst [smem:[#allocation18_spill]] %s1878_s16  ;;  %p97_p0 = scmp.ne.s32.totalorder %s1866_s13, %s1862_s12 }
   0xf   : > { %3273 = sst [smem:[#allocation19_spill]] %s1882_s17  ;;  %p1954_p1 = scmp.eq.s32.totalorder %s1487_s18, 0 }
  0x10   : > { %p127_p2 = scmp.eq.s32.totalorder %s1488_s19, 1  ;;  %p1489_p4 = scmp.ge.s32.totalorder %s1882_s17, 1 }
  0x11   : > { %p1960_p3 = por %p1954_p1, %p97_p0  ;;  %p134_p6 = scmp.lt.s32.totalorder %s1882_s17, 3 }
  0x12   : > { %p1965_p5 = por %p127_p2, %p97_p0  ;;  %s3277_s0 = sld [smem:[#allocation29_spill]] }
  0x13   : > { %p1973_p7 = pnand %p1489_p4, %p134_p6  ;;  %p1492_p8 = scmp.ge.s32.totalorder %s1882_s17, 2 }
  0x14   : > { %s3279_s1 = sld [smem:[#allocation30_spill]]  ;;  %s1884_s30 = smov [#allocation8]  }
  0x15   : > { %p1624_p9 = pneg %p1973_p7  ;;  %s158_s4 = sshll.u32 %s1884_s30, 4  ;;  %s159_s4 = int_to_ptr.vmem [resolvable:$true] %s158_s4 }
  0x16   : > { %s1885_s5 = smov [#allocation4]   ;;  %p121_p11 = scmp.eq.s32.totalorder %s1487_s18, 1 }
  0x17   : > { %p1625_p10 = pnand %p1624_p9, %p1954_p1  ;;  %s33_s6 = sadd.s32 1, %s1878_s16 }
  0x18   : > { %s146_s25 = sshll.u32 %s3277_s0, 4  ;;  %p35_p12 = scmp.ge.s32.totalorder %s33_s6, 2  ;;  %s147_s25 = int_to_ptr.hbm [resolvable:$true] %s146_s25 }
  0x19   : > { %1627 = dma.hbm_to_smem (!%p1625_p10), %s147_s25, 16, %s1885_s5, [#allocation7]  }
  0x1a   : > { %s156_s29 = sshll.u32 %s3279_s1, 4  ;;  %s84_s7 = sadd.s32 1, %s1870_s14  ;;  %s157_s29 = int_to_ptr.hbm [resolvable:$true] %s156_s29 }
  0x1b   : > { %1630 = dma.hbm_to_vmem [thread:$0]  (!%p1625_p10), %s157_s29, 32, %s159_s4, [#allocation5]  }
  0x1c   : > { %p91_p13 = scmp.ne.s32.totalorder %s1870_s14, %s1866_s13  ;;  %p92_p0 = scmp.eq.s32.totalorder %s1882_s17, 0 }
  0x1d   : > { %s3383_s6 = smov (%p35_p12, %s33_s6), 0  ;;  %p1641_p4 = scmp.lt.s32.totalorder %s1882_s17, 2 }
  0x1e   : > { %3280 = sst [smem:[#allocation20_spill]] %s3383_s6  ;;  %p1992_p2 = por %p121_p11, %p91_p13 }
  0x1f   : > { %s79_s9 = ssub.s32 %s1878_s16, %s3383_s6  ;;  %s169_s10 = sand.u32 1, %s1870_s14  }
  0x20   : > { %p82_p6 = scmp.eq.s32.totalorder %s79_s9, 0  ;;  %p93_p9 = por %p92_p0, %p91_p13 }
  0x21   : > { %s1493_s11 = sshll.u32 %s169_s10, 3  ;;  %s1611_s18 = sshll.u32 %s1878_s16, 3 }
  0x22   : > { %s2002_s19 = scalar_select %p82_p6, %s1870_s14, %s84_s7  }
  0x23   : > { %s3283_s2 = sld [smem:[#allocation31_spill]]  ;;  %s173_s28 = scalar_lea.vmem [#allocation9], %s1493_s11 }
  0x24   : > { %3282 = sst [smem:[#allocation21_spill]] %s2002_s19  ;;  %s184_s29 = sshll.u32 %s173_s28, 4  ;;  %s185_s29 = int_to_ptr.vmem [resolvable:$true] %s184_s29 }
  0x25   : > { %p1632_p10 = pnand %p1641_p4, %p93_p9  ;;  %s170_s30 = scalar_lea.sflag [#allocation10], %s169_s10 }
  0x27   : > { %193 = sbr.rel (%p1973_p7) target bundleno = 485 (0x1e5), region = 32 }
  0x29   : > { %s180_s25 = scalar_lea.hbm %s3283_s2, %s1611_s18 }
  0x2a   : > { %s182_s27 = sshll.u32 %s180_s25, 4  ;;  %s183_s27 = int_to_ptr.hbm [resolvable:$true] %s182_s27 }
  0x2b   : > { %1634 = dma.hbm_to_vmem [thread:$0]  (!%p1632_p10), %s183_s27, 128, %s185_s29, %s170_s30  }
  0x2c   : > { %1845 = dma.done.wait (%p1954_p1), [#allocation7], 16  }
  0x2d   : > { %1847 = vsyncadd (%p1954_p1), [#allocation7], 4294967280 }
  0x2e   : > { %1849 = dma.done.wait (%p1954_p1), [#allocation5], 32  }
  0x2f   : > { %1851 = vsyncadd (%p1954_p1), [#allocation5], 4294967264  ;;  %s2020_s4 = sand.u32 1, %s1866_s13  }
  0x30   : > { %s1499_s26 = sshll.u32 %s2020_s4, 3  ;;  %s206_s5 = scalar_lea.sflag [#allocation10], %s2020_s4 }
  0x31   : > { %s209_s7 = scalar_lea.vmem [#allocation9], %s1499_s26 }
  0x32   : > { %1853 = dma.done.wait (%p1960_p3), %s206_s5, 128  }
  0x33   : > { %1855 = vsyncadd (%p1960_p3), %s206_s5, 4294967168 }
  0x34   : > { %215 = sfence }
  0x35   : > { %v238_v0 = vlaneseq  ;;  %v244_v1 = vld [vmem:[%s209_s7] sm:$0xff]  ;;  %v3284_v2 = vmov 0  ;;  %v3249_v3 = vmov 0.0   ;;  %vm252_vm1 = vcmask 1043456   ;;  %s1888_s20 = smov 2   ;;  %s1889_s21 = smov 3  }
  0x36   : > { %247 = vst [vmem:[#allocation1] ss:$2 sm:$0xff] %v244_v1  ;;  %v1887_v10 = vmov -inf   ;;  %vm270_vm2 = vcmask 1040384   ;;  %s1890_s9 = smov 1   ;;  %s1891_s10 = smov 127  }
  0x37   : > { %vm2028_vm0 = vcmp.lt.s32.totalorder %v238_v0, 256  ;;  %s1892_s11 = smov 126   ;;  %s1893_s18 = smov 125   ;;  %v2055_v52 = vld [vmem:[#allocation8] sm:$0x3]  ;;  %vm393_vm15 = vcmask 7168  }
  0x38   : > { %v3285_v2 = vsel %vm2028_vm0, 4294967295, %v3284_v2  ;;  %242 = vst.msk [vmem:[#allocation2] sm:$0x3] %vm2028_vm0, %v3249_v3  ;;  %s2051_s23 = sld [smem:[#allocation4]]  ;;  %v325_v53 = vadd.s32 4294967295, %v2055_v52  ;;  %v319_v54 = vadd.s32 4294967294, %v2055_v52 }
  0x39   : > { %3286 = vst [vmem:[#allocation22_spill] sm:$0xff] %v3285_v2  ;;  %s2053_s24 = sld [smem:[#allocation4 + $0x1]]  ;;  %v313_v55 = vadd.s32 4294967293, %v2055_v52  ;;  %vm331_vm3 = vcmp.ge.s32.totalorder %v2055_v52, 0  ;;  %vm332_vm4 = vcmp.lt.s32.totalorder %v2055_v52, 16  ;;  %v336_v61 = vadd.s32 1, %v2055_v52 }
  0x3a   : > { %243 = vst.msk [vmem:[#allocation3] sm:$0x3] %vm2028_vm0, %v1887_v10  ;;  %s2057_s25 = sld [smem:[#allocation4 + $0x2]]  ;;  %vm326_vm5 = vcmp.ge.s32.totalorder %v325_v53, 0  ;;  %vm327_vm6 = vcmp.lt.s32.totalorder %v325_v53, 16  ;;  %vm320_vm7 = vcmp.ge.s32.totalorder %v319_v54, 0  ;;  %vm333_vm9 = vmand %vm331_vm3, %vm332_vm4 }
  0x3b   : > { %s2059_s27 = sld [smem:[#allocation4 + $0x3]]  ;;  %vm321_vm8 = vcmp.lt.s32.totalorder %v319_v54, 16  ;;  %vm314_vm10 = vcmp.ge.s32.totalorder %v313_v55, 0  ;;  %vm315_vm11 = vcmp.lt.s32.totalorder %v313_v55, 16  ;;  %vm328_vm12 = vmand %vm326_vm5, %vm327_vm6  ;;  %v1504_v57 = vsel %vm333_vm9, 1.0, %v3249_v3 }
  0x3c   : > { %s2062_s28 = sld [smem:[#allocation4 + $0x7]]  ;;  %vm322_vm13 = vmand %vm320_vm7, %vm321_vm8  ;;  %v2092_v58 = vsel %vm328_vm12, 1.0, %v3249_v3  ;;  %vm338_vm3 = vcmp.lt.s32.totalorder %v336_v61, 16  ;;  %vm377_vm4 = vcmask 15360   ;;  %vm361_vm5 = vcmask 23552  }
  0x3d   : > { %v248_v4 = vld.sshfl [vmem:[#allocation1] sm:$0xff pattern:$0x75316420]  ;;  %v249_v5 = vld.sshfl [vmem:[#allocation1 + $0x8] sm:$0xff pattern:$0x75316420]  ;;  %vm316_vm14 = vmand %vm314_vm10, %vm315_vm11 }
  0x3e   : > { %v253_v6 = vsel %vm252_vm1, %v248_v4, 0.0  ;;  %v260_v7 = vsel %vm252_vm1, %v249_v5, 0.0  ;;  %280 = vst [vmem:[#allocation1] ss:$2 sm:$0xff] %v244_v1  ;;  %s2065_s29 = sld [smem:[#allocation4 + $0x8]]  ;;  %v2097_v59 = vsel %vm322_vm13, 1.0, %v3249_v3 }
  0x3f   : > { %v254_v8 = vrot.slane %v253_v6, 4  ;;  %v261_v9 = vrot.slane %v260_v7, 4  ;;  %v245_v29 = vld [vmem:[#allocation2] sm:$0x3]  ;;  %s2068_s30 = sld [smem:[#allocation4 + $0x9]]  ;;  %v2100_v60 = vsel %vm316_vm14, 1.0, %v3249_v3  ;;  %v461_v10 = vstv %s2053_s24 }
  0x40   : > { %s2072_s26 = sld [smem:[#allocation4 + $0xa]]  ;;  %v3246_v0 = vperm.slane %v2092_v58, 0  ;;  %v383_v4 = vperm.slane %v2097_v59, 0  ;;  %v3248_v5 = vperm.slane %v2100_v60, 0  ;;  %vm410_vm10 = vcmask 1039360  }
  0x41   : > { %v255_v11 = vadd.f32 %v254_v8, %v253_v6  ;;  %v262_v12 = vadd.f32 %v261_v9, %v260_v7  ;;  %v279_v41 = vld [vmem:[#allocation3] sm:$0x3]  ;;  %s2074_s5 = sld [smem:[#allocation4 + $0x1c]]  ;;  %v3243_v6 = vperm.slane %v2092_v58, 1  ;;  %v3250_v8 = vperm.slane %v2097_v59, 1 }
  0x42   : > { %s2076_s7 = sld [smem:[#allocation4 + $0x1d]]  ;;  %v455_v9 = vstv %s2051_s23  ;;  %vm426_vm13 = vcmask 1031168  }
  0x43   : > { %v256_v13 = vrot.slane %v255_v11, 2  ;;  %v263_v14 = vrot.slane %v262_v12, 2  ;;  %s2102_s0 = sld [smem:[#allocation4 + $0x4]] }
  0x44   : > { %s2105_s1 = sld [smem:[#allocation4 + $0x11]] }
  0x45   : > { %v257_v15 = vadd.f32 %v256_v13, %v255_v11  ;;  %v264_v16 = vadd.f32 %v263_v14, %v262_v12  ;;  %v281_v17 = vld.sshfl [vmem:[#allocation1] sm:$0xff pattern:$0x75316420]  ;;  %v282_v18 = vld.sshfl [vmem:[#allocation1 + $0x8] sm:$0xff pattern:$0x75316420]  ;;  %v473_v11 = vstv %s2059_s27  ;;  %v514_v12 = vstv %s2062_s28 }
  0x46   : > { %v285_v19 = vsel %vm252_vm1, %v281_v17, -inf  ;;  %v292_v20 = vsel %vm252_vm1, %v282_v18, -inf  ;;  %s2113_s2 = sld [smem:[#allocation4 + $0xb]]  ;;  %v532_v7 = vstv %s2072_s26  ;;  %vm337_vm1 = vcmp.ge.s32.totalorder %v336_v61, 0 }
  0x47   : > { %v258_v21 = vrot.slane %v257_v15, 1  ;;  %v265_v22 = vrot.slane %v264_v16, 1  ;;  %v286_v23 = vrot.slane %v285_v19, 4  ;;  %v293_v24 = vrot.slane %v292_v20, 4  ;;  %s2119_s6 = sld [smem:[#allocation4 + $0x10]]  ;;  %vm2150_vm6 = vmand %vm337_vm1, %vm338_vm3 }
  0x48   : > { %s2125_s16 = sld [smem:[#allocation4 + $0xe]]  ;;  %v520_v13 = vstv %s2065_s29  ;;  %vm442_vm1 = vcmask 1022976   ;;  %vm790_vm3 = vcmask 785408  }
  0x49   : > { %v259_v25 = vadd.f32 %v258_v21, %v257_v15  ;;  %v266_v26 = vadd.f32 %v265_v22, %v264_v16  ;;  %v287_v27 = vmax.f32 %v285_v19, %v286_v23  ;;  %v294_v28 = vmax.f32 %v292_v20, %v293_v24  ;;  %s2129_s19 = sld [smem:[#allocation4 + $0xf]] }
  0x4a   : > { %v680_v16 = vstv %s2074_s5  ;;  %s2138_s27 = sld [smem:[#allocation4 + $0x20]]  ;;  %v686_v19 = vstv %s2076_s7  ;;  %v342_v23 = vadd.s32 2, %v2055_v52  ;;  %v467_v24 = vstv %s2057_s25 }
  0x4b   : > { %v269_v30 = vrot.slane %v266_v26, 7  ;;  %v288_v31 = vrot.slane %v287_v27, 2  ;;  %v295_v32 = vrot.slane %v294_v28, 2  ;;  %s2146_s26 = sld [smem:[#allocation4 + $0x2a]] }
  0x4c   : > { %s2168_s14 = sld [smem:[#allocation4 + $0x27]]  ;;  %vm343_vm7 = vcmp.ge.s32.totalorder %v342_v23, 0  ;;  %vm344_vm8 = vcmp.lt.s32.totalorder %v342_v23, 16 }
  0x4d   : > { %v271_v33 = vsel %vm270_vm2, %v259_v25, %v269_v30  ;;  %v289_v34 = vmax.f32 %v287_v27, %v288_v31  ;;  %v296_v35 = vmax.f32 %v294_v28, %v295_v32  ;;  %v526_v25 = vstv %s2068_s30  ;;  %s2178_s25 = sld [smem:[#allocation4 + $0x2d]]  ;;  %vm2222_vm9 = vmand %vm343_vm7, %vm344_vm8 }
  0x4e   : > { %v273_v36 = vadd.f32 %v271_v33, %v245_v29  ;;  %v591_v30 = vstv %s2105_s1  ;;  %v3251_v32 = vperm.slane %v2100_v60, 1  ;;  %s2190_s1 = sld [smem:[#allocation4 + $0x2c]]  ;;  %vm624_vm7 = vcmask 130048  }
  0x4f   : > { %v290_v37 = vrot.slane %v289_v34, 1  ;;  %v297_v38 = vrot.slane %v296_v35, 1  ;;  %s2192_s30 = sld [smem:[#allocation4 + $0x5]] }
  0x50   : > { %278 = vst.msk [vmem:[#allocation2] sm:$0x3] %vm2028_vm0, %v273_v36  ;;  %v2183_v36 = vsel %vm2150_vm6, 1.0, %v3249_v3  ;;  %s2242_s13 = sld [smem:[#allocation4 + $0x12]]  ;;  %vm506_vm6 = vcmask 392192  }
  0x51   : > { %v291_v39 = vmax.f32 %v289_v34, %v290_v37  ;;  %v298_v40 = vmax.f32 %v296_v35, %v297_v38  ;;  %s2253_s17 = sld [smem:[#allocation4 + $0x13]] }
  0x52   : > { %s2367_s23 = sld [smem:[#allocation4 + $0x6]] }
  0x53   : > { %v301_v42 = vrot.slane %v298_v40, 7  ;;  %v573_v40 = vstv %s2125_s16  ;;  %s2383_s24 = sld [smem:[#allocation4 + $0xd]] }
  0x54   : > { %s2400_s28 = sld [smem:[#allocation4 + $0x22]] }
  0x55   : > { %v302_v43 = vsel %vm270_vm2, %v291_v39, %v301_v42  ;;  %v585_v39 = vstv %s2119_s6  ;;  %s2213_s6 = sld [smem:[#allocation4 + $0x21]] }
  0x56   : > { %v304_v44 = vmax.f32 %v279_v41, %v302_v43  ;;  %s2408_s29 = sld [smem:[#allocation4 + $0x29]] }
  0x57   : > { %v309_v45 = vld [vmem:[#allocation2] sm:$0x3]  ;;  %s2534_s16 = sld [smem:[#allocation4 + $0x32]] }
  0x58   : > { %v2045_v46 = vmul.f32 0.25, %v309_v45  ;;  %305 = vst.msk [vmem:[#allocation3] sm:$0x3] %vm2028_vm0, %v304_v44  ;;  %v579_v45 = vstv %s2129_s19  ;;  %s2546_s19 = sld [smem:[#allocation4 + $0x30]] }
  0x59   : > { %s2554_s5 = sld [smem:[#allocation4 + $0x33]] }
  0x5a   : > { %v355_v47 = vperm.slane %v2045_v46, 0  ;;  %v356_v48 = vperm.slane %v2045_v46, 1  ;;  %v2108_v62 = vmul.f32 %v1504_v57, %v2045_v46  ;;  %s2564_s7 = sld [smem:[#allocation4 + $0x34]] }
  0x5c   : > { %373 = vrot.lane.b32.xlu1 %v355_v47, %s1888_s20  ;;  %357 = vrot.lane.b32.xlu0 %v355_v47, %s1889_s21  ;;  %3287 = vst [vmem:[#allocation23_spill] sm:$0xff] %v2108_v62  ;;  %v2134_v15 = vmul.f32 %v532_v7, %v2108_v62  ;;  %v2141_v18 = vmul.f32 %v473_v11, %v2108_v62 }
  0x5d   : > { %389 = vrot.lane.b32.xlu2 %v355_v47, %s1890_s9  ;;  %v2196_v41 = vmul.f32 %v591_v30, %v2108_v62 }
  0x5f   : > { %v311_v49 = vld [vmem:[#allocation3] sm:$0x3] }
  0x60   : > { %v858_v50 = vperm.slane %v311_v49, 1  ;;  %v857_v51 = vperm.slane %v311_v49, 0  ;;  %v2110_v63 = vmul.f32 %v1504_v57, %v311_v49 }
  0x64   : > { %375 = vrot.lane.b32.xlu1 %v356_v48, %s1888_s20  ;;  %359 = vrot.lane.b32.xlu0 %v356_v48, %s1889_s21 }
  0x65   : > { %391 = vrot.lane.b32.xlu2 %v356_v48, %s1890_s9 }
  0x6c   : > { %408 = vrot.lane.b32.xlu1 %v356_v48, %s1891_s10  ;;  %406 = vrot.lane.b32.xlu0 %v355_v47, %s1891_s10 }
  0x6d   : > { %422 = vrot.lane.b32.xlu2 %v355_v47, %s1892_s11 }
  0x74   : > { %861 = vrot.lane.b32.xlu1 %v858_v50, %s1889_s21  ;;  %424 = vrot.lane.b32.xlu0 %v356_v48, %s1892_s11 }
  0x75   : > { %869 = vrot.lane.b32.xlu2 %v857_v51, %s1888_s20 }
  0x7c   : > { %879 = vrot.lane.b32.xlu1 %v857_v51, %s1890_s9  ;;  %859 = vrot.lane.b32.xlu0 %v857_v51, %s1889_s21  ;;  %s2082_s21 = sld [smem:[#allocation4 + $0x1f]] }
  0x7d   : > { %881 = vrot.lane.b32.xlu2 %v858_v50, %s1890_s9  ;;  %s2084_s9 = sld [smem:[#allocation4 + $0x23]] }
  0x82   : > { %v698_v17 = vstv %s2082_s21  ;;  %s2158_s21 = sld [smem:[#allocation4 + $0x2b]] }
  0x83   : > { %v739_v20 = vstv %s2084_s9  ;;  %v2166_v29 = vmul.f32 %v698_v17, %v2108_v62  ;;  %s2575_s9 = sld [smem:[#allocation4 + $0x38]] }
  0x84   : > { %890 = vrot.lane.b32.xlu1 %v857_v51, %s1891_s10  ;;  %871 = vrot.lane.b32.xlu0 %v858_v50, %s1888_s20  ;;  %s2080_s20 = sld [smem:[#allocation4 + $0x1e]] }
  0x85   : > { %892 = vrot.lane.b32.xlu2 %v858_v50, %s1891_s10  ;;  %s2086_s10 = sld [smem:[#allocation4 + $0x24]] }
  0x8a   : > { %v692_v28 = vstv %s2080_s20  ;;  %s2205_s20 = sld [smem:[#allocation4 + $0xc]] }
  0x8b   : > { %v3252_v21 = vstv %s2086_s10 }
  0x8c   : > { %440 = vrot.lane.b32.xlu1 %v356_v48, %s1893_s18  ;;  %438 = vrot.lane.b32.xlu0 %v355_v47, %s1893_s18 }
  0x8d   : > { %900 = vrot.lane.b32.xlu2 %v857_v51, %s1892_s11 }
  0x94   : > { %902 = vrot.lane.b32.xlu0 %v858_v50, %s1892_s11  ;;  %910 = vrot.lane.b32.xlu1 %v857_v51, %s1893_s18  ;;  %s2088_s11 = sld [smem:[#allocation4 + $0x25]] }
  0x95   : > { %912 = vrot.lane.b32.xlu2 %v858_v50, %s1893_s18  ;;  %s2094_s18 = sld [smem:[#allocation4 + $0x26]]  ;;  %v810_v50 = vstv %s2190_s1 }
  0x96   : > { %s2703_s1 = sld [smem:[#allocation4 + $0x3f]] }
  0x9a   : > { %v3247_v35 = vstv %s2088_s11 }
  0x9b   : > { %v757_v26 = vstv %s2094_s18  ;;  %s2229_s18 = sld [smem:[#allocation4 + $0x28]] }
  0x9c   : > { %v2187_v38 = vmul.f32 %v757_v26, %v2108_v62 }
  0xb7   : > { %v2078_v56 = vpop.permute.xlu2 %389 }
  0xb8   : > { %v397_v14 = vsel %vm393_vm15, 0.0, %v2078_v56 }
  0xb9   : > { %v2162_v27 = vmul.f32 %v3246_v0, %v397_v14 }
  0xbb   : > { %v2203_v43 = vmul.f32 %v526_v25, %v2162_v27  ;;  %v2208_v44 = vmul.f32 %v467_v24, %v2162_v27  ;;  %v2216_v48 = vmul.f32 %v692_v28, %v2162_v27  ;;  %v2219_v49 = vmul.f32 %v585_v39, %v2162_v27 }
  0xbc   : > { %v2293_v17 = vmul.f32 %v810_v50, %v2162_v27 }
  0xbf   : > { %v392_v1 = vpop.permute.xlu2 %391 }
  0xc0   : > { %v394_v31 = vsel %vm393_vm15, %v2078_v56, %v392_v1 }
  0xc1   : > { %v2200_v42 = vmul.f32 %v3243_v6, %v394_v31  ;;  %v2251_v6 = vsel %vm2222_vm9, 1.0, %v3249_v3 }
  0xc2   : > { %3293 = vst [vmem:[#allocation25_spill] sm:$0xff] %v2251_v6 }
  0xc3   : > { %3290 = vst [vmem:[#allocation24_spill] sm:$0xff] %v2200_v42  ;;  %v2237_v14 = vmul.f32 %v467_v24, %v2200_v42  ;;  %v816_v24 = vstv %s2178_s25  ;;  %v2265_v23 = vmul.f32 %v692_v28, %v2200_v42  ;;  %v2271_v54 = vmul.f32 %v3247_v35, %v2200_v42  ;;  %s2280_s25 = sld [smem:[#allocation4 + $0x2e]] }
  0xc4   : > { %v2274_v22 = vmul.f32 %v526_v25, %v2200_v42  ;;  %v2286_v25 = vmul.f32 %v816_v24, %v2108_v62  ;;  %v601_v24 = vstv %s2242_s13  ;;  %v2321_v34 = vmul.f32 %v810_v50, %v2200_v42  ;;  %s2528_s13 = sld [smem:[#allocation4 + $0x31]] }
  0xc7   : > { %v2174_v33 = vpop.permute.xlu2 %422 }
  0xce   : > { %v374_v7 = vpop.permute.xlu1 %373  ;;  %v358_v11 = vpop.permute.xlu0 %357 }
  0xcf   : > { %v381_v26 = vsel %vm377_vm4, 0.0, %v374_v7  ;;  %v365_v30 = vsel %vm361_vm5, 0.0, %v358_v11  ;;  %v2246_v31 = vpop.permute.xlu2 %869 }
  0xd0   : > { %v2258_v0 = vmul.f32 %v383_v4, %v381_v26  ;;  %v2262_v57 = vmul.f32 %v3248_v5, %v365_v30  ;;  %v2278_v30 = vmul.f32 %v585_v39, %v2200_v42  ;;  %v876_v26 = vsel %vm377_vm4, 0.0, %v2246_v31 }
  0xd1   : > { %v2317_v5 = vmul.f32 %v876_v26, %v383_v4 }
  0xd2   : > { %3294 = vst [vmem:[#allocation26_spill] sm:$0xff] %v2262_v57  ;;  %v515_v28 = vmul.f32 %v514_v12, %v2262_v57  ;;  %v521_v35 = vmul.f32 %v520_v13, %v2258_v0  ;;  %v456_v56 = vmul.f32 %v455_v9, %v2262_v57  ;;  %v462_v53 = vmul.f32 %v461_v10, %v2258_v0 }
  0xd3   : > { %v681_v39 = vmul.f32 %v680_v16, %v2262_v57  ;;  %v687_v51 = vmul.f32 %v686_v19, %v2258_v0  ;;  %v574_v4 = vmul.f32 %v573_v40, %v2262_v57  ;;  %v580_v47 = vmul.f32 %v579_v45, %v2258_v0 }
  0xd5   : > { %v689_v26 = vadd.f32 %v687_v51, %v681_v39 }
  0xd6   : > { %v376_v55 = vpop.permute.xlu1 %375  ;;  %v360_v37 = vpop.permute.xlu0 %359 }
  0xd7   : > { %v378_v46 = vsel %vm377_vm4, %v374_v7, %v376_v55  ;;  %v362_v3 = vsel %vm361_vm5, %v358_v11, %v360_v37  ;;  %v2326_v1 = vpop.permute.xlu2 %881  ;;  %v348_v37 = vadd.s32 3, %v2055_v52  ;;  %v523_v7 = vadd.f32 %v521_v35, %v515_v28 }
  0xd8   : > { %v2334_v50 = vmul.f32 %v3250_v8, %v378_v46  ;;  %v2338_v55 = vmul.f32 %v3251_v32, %v362_v3  ;;  %v464_v11 = vadd.f32 %v462_v53, %v456_v56  ;;  %v3300_v8 = vstv %s2158_s21 }
  0xd9   : > { %vm349_vm11 = vcmp.ge.s32.totalorder %v348_v37, 0  ;;  %vm350_vm12 = vcmp.lt.s32.totalorder %v348_v37, 16  ;;  %v529_v39 = vadd.f32 %v2203_v43, %v523_v7  ;;  %v805_v32 = vmul.f32 %v3300_v8, %v2258_v0 }
  0xda   : > { %3295 = vst [vmem:[#allocation27_spill] sm:$0xff] %v2334_v50  ;;  %v457_v46 = vmul.f32 %v455_v9, %v2338_v55  ;;  %v463_v3 = vmul.f32 %v461_v10, %v2334_v50  ;;  %v682_v52 = vmul.f32 %v680_v16, %v2338_v55  ;;  %v688_v35 = vmul.f32 %v686_v19, %v2334_v50  ;;  %vm2363_vm14 = vmand %vm349_vm11, %vm350_vm12 }
  0xdb   : > { %3296 = vst [vmem:[#allocation28_spill] sm:$0xff] %v2338_v55  ;;  %v741_v51 = vmul.f32 %v739_v20, %v2338_v55  ;;  %v747_v53 = vmul.f32 %v3252_v21, %v2334_v50  ;;  %v516_v10 = vmul.f32 %v514_v12, %v2338_v55  ;;  %v522_v16 = vmul.f32 %v520_v13, %v2334_v50 }
  0xdc   : > { %v465_v9 = vadd.f32 %v463_v3, %v457_v46  ;;  %v3299_v19 = vstv %s2146_s26  ;;  %v690_v37 = vadd.f32 %v688_v35, %v682_v52  ;;  %v470_v12 = vadd.f32 %v2208_v44, %v464_v11 }
  0xdd   : > { %v799_v28 = vmul.f32 %v3299_v19, %v2262_v57  ;;  %v749_v61 = vadd.f32 %v747_v53, %v741_v51  ;;  %v582_v13 = vadd.f32 %v580_v47, %v574_v4  ;;  %v2389_v19 = vmul.f32 %v739_v20, %v2262_v57 }
  0xde   : > { %v409_v46 = vpop.permute.xlu1 %408  ;;  %v407_v3 = vpop.permute.xlu0 %406  ;;  %v3301_v52 = vmov 0.0   ;;  %v695_v44 = vadd.f32 %v2216_v48, %v689_v26  ;;  %v3302_v47 = vperm.slane %v2183_v36, 1  ;;  %v471_v20 = vadd.f32 %v2237_v14, %v465_v9 }
  0xdf   : > { %v414_v43 = vsel %vm410_vm10, %v409_v46, 0.0  ;;  %v411_v8 = vsel %vm410_vm10, %v407_v3, %v409_v46  ;;  %v2393_v7 = vpop.permute.xlu2 %892  ;;  %v2398_v35 = vsel %vm2363_vm14, 1.0, %v3301_v52  ;;  %v524_v11 = vadd.f32 %v522_v16, %v516_v10 }
  0xe0   : > { %v2405_v4 = vmul.f32 %v3302_v47, %v414_v43  ;;  %v575_v51 = vmul.f32 %v573_v40, %v2338_v55  ;;  %v3303_v53 = vperm.slane %v2183_v36, 0  ;;  %v897_v48 = vsel %vm410_vm10, %v2393_v7, 0.0 }
  0xe1   : > { %v696_v26 = vadd.f32 %v2265_v23, %v690_v37  ;;  %v581_v14 = vmul.f32 %v579_v45, %v2334_v50  ;;  %v3304_v9 = vperm.slane %v2134_v15, 0  ;;  %v3305_v16 = vperm.slane %v2141_v18, 0 }
  0xe2   : > { %v2415_v56 = vmul.f32 %v3303_v53, %v411_v8  ;;  %v755_v46 = vadd.f32 %v2271_v54, %v749_v61  ;;  %v2428_v3 = vadd.f32 %v805_v32, %v799_v28  ;;  %v3306_v37 = vperm.slane %v2166_v29, 0 }
  0xe3   : > { %v539_v10 = vadd.f32 %v3304_v9, %v529_v39  ;;  %v480_v40 = vadd.f32 %v3305_v16, %v470_v12  ;;  %v588_v8 = vadd.f32 %v2219_v49, %v582_v13  ;;  %v3307_v39 = vmov %v3302_v47 }
  0xe4   : > { %v705_v45 = vadd.f32 %v3306_v37, %v695_v44  ;;  %v2437_v52 = vmul.f32 %v897_v48, %v3307_v39  ;;  %v3308_v54 = vperm.slane %v2141_v18, 1  ;;  %v3309_v32 = vstv %s2102_s0  ;;  %s2484_s0 = sld [smem:[#allocation4 + $0x14]] }
  0xe5   : > { %v485_v28 = vmul.f32 %v3309_v32, %v2405_v4  ;;  %v3310_v47 = vstv %s2113_s2  ;;  %v3311_v44 = vperm.slane %v2166_v29, 1  ;;  %v530_v49 = vadd.f32 %v2274_v22, %v524_v11 }
  0xe6   : > { %v481_v61 = vadd.f32 %v3308_v54, %v471_v20  ;;  %v543_v53 = vmul.f32 %v3310_v47, %v2415_v56  ;;  %v583_v13 = vadd.f32 %v581_v14, %v575_v51  ;;  %v862_v48 = vpop.permute.xlu1 %861  ;;  %v425_v16 = vpop.permute.xlu0 %424  ;;  %v3312_v20 = vmov %v3309_v32 }
  0xe7   : > { %v706_v9 = vadd.f32 %v3311_v44, %v696_v26  ;;  %v484_v37 = vmul.f32 %v3312_v20, %v2415_v56  ;;  %v3313_v39 = vstv %s2138_s27  ;;  %v3314_v32 = vperm.slane %v2187_v38, 1  ;;  %v2463_v11 = vpop.permute.xlu2 %900  ;;  %s2615_s27 = sld [smem:[#allocation4 + $0x35]] }
  0xe8   : > { %v710_v54 = vmul.f32 %v3313_v39, %v2405_v4  ;;  %v427_v29 = vsel %vm426_vm13, %v2174_v33, %v425_v16  ;;  %v430_v22 = vsel %vm426_vm13, %v425_v16, 0.0  ;;  %v3315_v26 = vstv %s2168_s14 }
  0xe9   : > { %v765_v47 = vadd.f32 %v3314_v32, %v755_v46  ;;  %v769_v14 = vmul.f32 %v3315_v26, %v2405_v4  ;;  %v3316_v44 = vperm.slane %v2251_v6, 0  ;;  %v3317_v46 = vperm.slane %v2251_v6, 1 }
  0xea   : > { %v487_v16 = vadd.f32 %v485_v28, %v481_v61  ;;  %v545_v32 = vadd.f32 %v543_v53, %v539_v10  ;;  %v3318_v51 = vperm.slane %v2134_v15, 1  ;;  %v3319_v18 = vstv %s2113_s2  ;;  %s2521_s2 = sld [smem:[#allocation4 + $0x2f]] }
  0xeb   : > { %v2471_v20 = vmul.f32 %v3316_v44, %v427_v29  ;;  %v2475_v33 = vmul.f32 %v3317_v46, %v430_v22  ;;  %v544_v29 = vmul.f32 %v3319_v18, %v2405_v4  ;;  %v589_v44 = vadd.f32 %v2278_v30, %v583_v13 }
  0xec   : > { %v540_v26 = vadd.f32 %v3318_v51, %v530_v49  ;;  %v603_v61 = vmul.f32 %v601_v24, %v2405_v4  ;;  %v3320_v28 = vmov %v3313_v39  ;;  %v3321_v15 = vperm.slane %v2196_v41, 0 }
  0xed   : > { %v709_v10 = vmul.f32 %v3320_v28, %v2415_v56  ;;  %v602_v49 = vmul.f32 %v601_v24, %v2415_v56  ;;  %v3322_v18 = vstv %s2192_s30  ;;  %v3323_v30 = vstv %s2205_s20  ;;  %s2714_s30 = sld [smem:[#allocation4 + $0x40]] }
  0xee   : > { %v598_v53 = vadd.f32 %v3321_v15, %v588_v8  ;;  %v491_v22 = vmul.f32 %v3322_v18, %v2475_v33  ;;  %v549_v13 = vmul.f32 %v3323_v30, %v2471_v20  ;;  %v3324_v51 = vstv %s2146_s26  ;;  %v860_v57 = vpop.permute.xlu0 %859  ;;  %s2633_s26 = sld [smem:[#allocation4 + $0x3c]] }
  0xef   : > { %v800_v46 = vmul.f32 %v3324_v51, %v2338_v55  ;;  %v3325_v39 = vstv %s2158_s21  ;;  %v3326_v28 = vmov %v3322_v18  ;;  %v3327_v8 = vstv %s2213_s6  ;;  %s2666_s21 = sld [smem:[#allocation4 + $0x37]] }
  0xf0   : > { %v806_v12 = vmul.f32 %v3325_v39, %v2334_v50  ;;  %v490_v23 = vmul.f32 %v3326_v28, %v2471_v20  ;;  %v716_v15 = vmul.f32 %v3327_v8, %v2475_v33  ;;  %v3328_v24 = vstv %s2229_s18  ;;  %v880_v28 = vpop.permute.xlu1 %879  ;;  %s2719_s20 = sld [smem:[#allocation4 + $0x3d]] }
  0xf1   : > { %v775_v21 = vmul.f32 %v3328_v24, %v2475_v33  ;;  %v3329_v18 = vmov %v3323_v30  ;;  %v486_v30 = vadd.f32 %v484_v37, %v480_v40  ;;  %v712_v2 = vadd.f32 %v710_v54, %v706_v9  ;;  %v2538_v37 = vpop.permute.xlu2 %912 }
  0xf2   : > { %v550_v43 = vmul.f32 %v3329_v18, %v2475_v33  ;;  %v3330_v51 = vperm.slane %v2196_v41, 1  ;;  %v3331_v39 = vstv %s2253_s17  ;;  %v771_v50 = vadd.f32 %v769_v14, %v765_v47  ;;  %s2588_s17 = sld [smem:[#allocation4 + $0x39]] }
  0xf3   : > { %v609_v42 = vmul.f32 %v3331_v39, %v2475_v33  ;;  %v546_v8 = vadd.f32 %v544_v29, %v540_v26  ;;  %v711_v55 = vadd.f32 %v709_v10, %v705_v45  ;;  %v604_v6 = vadd.f32 %v602_v49, %v598_v53 }
  0xf4   : > { %v599_v62 = vadd.f32 %v3330_v51, %v589_v44  ;;  %v2530_v24 = vadd.f32 %v491_v22, %v487_v16  ;;  %v2532_v18 = vadd.f32 %v549_v13, %v545_v32  ;;  %v808_v41 = vadd.f32 %v806_v12, %v800_v46 }
  0xf5   : > { %v2536_v9 = vadd.f32 %v490_v23, %v486_v30  ;;  %v2540_v54 = vadd.f32 %v716_v15, %v712_v2  ;;  %v2542_v45 = vadd.f32 %v775_v21, %v771_v50  ;;  %v2544_v47 = vadd.f32 %v550_v43, %v546_v8 }
  0xf6   : > { %v605_v40 = vadd.f32 %v603_v61, %v599_v62  ;;  %v883_v62 = vsel %vm393_vm15, %v880_v28, %v2326_v1  ;;  %v886_v12 = vsel %vm393_vm15, 0.0, %v880_v28  ;;  %v613_v14 = vstv %s2484_s0  ;;  %s2807_s0 = sld [smem:[#allocation4 + $0x45]] }
  0xf7   : > { %v863_v2 = vsel %vm361_vm5, %v860_v57, %v862_v48  ;;  %v866_v21 = vsel %vm361_vm5, 0.0, %v860_v57  ;;  %v3332_v50 = vstv %s2213_s6  ;;  %v3333_v16 = vmov %v3331_v39  ;;  %s2732_s6 = sld [smem:[#allocation4 + $0x41]] }
  0xf8   : > { %v2551_v23 = vadd.f32 %v609_v42, %v605_v40  ;;  %v715_v43 = vmul.f32 %v3332_v50, %v2471_v20  ;;  %v608_v32 = vmul.f32 %v3333_v16, %v2471_v20  ;;  %v917_v42 = vsel %vm442_vm1, %v2538_v37, 0.0 }
  0xf9   : > { %v814_v1 = vadd.f32 %v2321_v34, %v808_v41  ;;  %v3334_v26 = vstv %s2280_s25  ;;  %v3335_v48 = vstv %s2086_s10  ;;  %v3336_v44 = vperm.slane %v2092_v58, 0  ;;  %s2602_s10 = sld [smem:[#allocation4 + $0x3a]]  ;;  %s1895_s25 = smov 32  }
  0xfa   : > { %v828_v29 = vmul.f32 %v3334_v26, %v2405_v4  ;;  %v746_v57 = vmul.f32 %v3335_v48, %v2258_v0  ;;  %v3337_v10 = vperm.slane %v2092_v58, 1  ;;  %v832_v49 = vstv %s2521_s2  ;;  %s1896_s2 = smov 112  }
  0xfb   : > { %v2579_v61 = vmul.f32 %v886_v12, %v3336_v44  ;;  %v813_v34 = vadd.f32 %v2293_v17, %v2428_v3  ;;  %v3338_v22 = vperm.slane %v2100_v60, 0  ;;  %v3339_v46 = vperm.slane %v2100_v60, 1  ;;  %v891_v17 = vpop.permute.xlu1 %890  ;;  %v872_v3 = vpop.permute.xlu0 %871 }
  0xfc   : > { %v2583_v53 = vmul.f32 %v883_v62, %v3337_v10  ;;  %v748_v30 = vadd.f32 %v746_v57, %v2389_v19  ;;  %v3340_v58 = vstv %s2088_s11  ;;  %v3341_v39 = vperm.slane %v2398_v35, 1  ;;  %s2623_s11 = sld [smem:[#allocation4 + $0x3b]] }
  0xfd   : > { %v2592_v13 = vmul.f32 %v866_v21, %v3338_v22  ;;  %v2596_v15 = vmul.f32 %v863_v2, %v3339_v46  ;;  %v752_v51 = vmul.f32 %v3340_v58, %v2162_v27  ;;  %v2608_v8 = vadd.f32 %v715_v43, %v711_v55 }
  0xfe   : > { %v2606_v28 = vmul.f32 %v917_v42, %v3341_v39  ;;  %v2610_v60 = vadd.f32 %v608_v32, %v604_v6  ;;  %v3342_v40 = vmov %v3334_v26  ;;  %v873_v41 = vsel %vm377_vm4, %v2246_v31, %v872_v3 }
  0xff   : > { %v827_v19 = vmul.f32 %v3342_v40, %v2415_v56  ;;  %v3343_v62 = vperm.slane %v2286_v25, 1  ;;  %v834_v2 = vmul.f32 %v832_v49, %v2475_v33  ;;  %v833_v55 = vmul.f32 %v832_v49, %v2471_v20 }
 0x100   : > { %v3344_v6 = vperm.slane %v2097_v59, 1  ;;  %v838_v50 = vstv %s2546_s19  ;;  %v3345_v31 = vperm.slane %v2286_v25, 0  ;;  %v921_v16 = vstv %s2528_s13  ;;  %s1897_s13 = smov 96   ;;  %s2824_s19 = sld [smem:[#allocation4 + $0x4e]] }
 0x101   : > { %v824_v12 = vadd.f32 %v3343_v62, %v814_v1  ;;  %v894_v32 = vsel %vm410_vm10, %v891_v17, %v2393_v7  ;;  %v754_v1 = vadd.f32 %v752_v51, %v748_v30  ;;  %v760_v59 = vperm.slane %v2187_v38, 0 }
 0x102   : > { %v2627_v21 = vmul.f32 %v873_v41, %v3344_v6  ;;  %v823_v43 = vadd.f32 %v3345_v31, %v813_v34  ;;  %v3346_v48 = vstv %s2168_s14  ;;  %v927_v44 = vstv %s2534_s16  ;;  %s2660_s14 = sld [smem:[#allocation4 + $0x36]] }
 0x103   : > { %v830_v42 = vadd.f32 %v828_v29, %v824_v12  ;;  %v768_v57 = vmul.f32 %v3346_v48, %v2415_v56  ;;  %v933_v10 = vstv %s2554_s5  ;;  %v923_v25 = vmul.f32 %v921_v16, %v2596_v15  ;;  %v439_v40 = vpop.permute.xlu0 %438  ;;  %s2816_s16 = sld [smem:[#allocation4 + $0x4d]] }
 0x104   : > { %v829_v26 = vadd.f32 %v827_v19, %v823_v43  ;;  %v929_v49 = vmul.f32 %v927_v44, %v2627_v21  ;;  %v939_v34 = vstv %s2564_s7  ;;  %v3264_v22 = vstv %s2575_s9  ;;  %s2831_s5 = sld [smem:[#allocation4 + $0x4f]] }
 0x105   : > { %v3347_v7 = vperm.slane %v2183_v36, 0  ;;  %v2651_v38 = vadd.f32 %v834_v2, %v830_v42  ;;  %v3348_v46 = vstv %s2229_s18  ;;  %v3263_v58 = vstv %s2588_s17  ;;  %v441_v36 = vpop.permute.xlu1 %440  ;;  %s1894_s18 = smov 48   ;;  %s2841_s7 = sld [smem:[#allocation4 + $0x50]] }
 0x106   : > { %v774_v30 = vmul.f32 %v3348_v46, %v2471_v20  ;;  %v2657_v51 = vadd.f32 %v833_v55, %v829_v26  ;;  %v764_v17 = vadd.f32 %v760_v59, %v754_v1  ;;  %v931_v3 = vadd.f32 %v929_v49, %v923_v25 }
 0x107   : > { %v2649_v29 = vmul.f32 %v894_v32, %v3347_v7  ;;  %v935_v39 = vmul.f32 %v933_v10, %v2583_v53  ;;  %v2663_v19 = vmul.f32 %v939_v34, %v2110_v63  ;;  %v949_v41 = vstv %s2615_s27  ;;  %s2852_s27 = sld [smem:[#allocation4 + $0x54]] }
 0x108   : > { %v980_v62 = vmul.f32 %v3264_v22, %v2592_v13  ;;  %v3262_v12 = vstv %s2602_s10  ;;  %v446_v2 = vsel %vm442_vm1, %v441_v36, 0.0  ;;  %v443_v55 = vsel %vm442_vm1, %v439_v40, %v441_v36 }
 0x109   : > { %v770_v6 = vadd.f32 %v768_v57, %v764_v17  ;;  %v986_v31 = vmul.f32 %v3263_v58, %v2317_v5  ;;  %v3349_v43 = vperm.slane %v2398_v35, 1  ;;  %v3350_v42 = vperm.slane %v2398_v35, 0 }
 0x10a   : > { %v997_v59 = vstv %s2623_s11  ;;  %v3261_v26 = vstv %s2633_s26  ;;  %v937_v25 = vadd.f32 %v935_v39, %v931_v3  ;;  %v992_v57 = vmul.f32 %v3262_v12, %v2579_v61  ;;  %s2847_s11 = sld [smem:[#allocation4 + $0x51]] }
 0x10b   : > { %v2679_v32 = vmul.f32 %v3349_v43, %v446_v2  ;;  %v2683_v1 = vmul.f32 %v3350_v42, %v443_v55  ;;  %v2687_v48 = vadd.f32 %v774_v30, %v770_v6  ;;  %v922_v49 = vmul.f32 %v921_v16, %v2592_v13 }
 0x10c   : > { %v3351_v34 = vstv %s2367_s23  ;;  %v3352_v46 = vstv %s2383_s24  ;;  %v943_v30 = vperm.slane %v2663_v19, 1  ;;  %v988_v3 = vadd.f32 %v986_v31, %v980_v62  ;;  %s2743_s23 = sld [smem:[#allocation4 + $0x42]] }
 0x10d   : > { %v497_v7 = vmul.f32 %v3351_v34, %v2679_v32  ;;  %v555_v17 = vmul.f32 %v3352_v46, %v2683_v1  ;;  %v3353_v36 = vmov %v3351_v34  ;;  %v2706_v39 = vmul.f32 %v997_v59, %v2110_v63  ;;  %s2753_s24 = sld [smem:[#allocation4 + $0x3e]] }
 0x10e   : > { %v496_v40 = vmul.f32 %v3353_v36, %v2683_v1  ;;  %v2711_v16 = vmul.f32 %v3261_v26, %v2649_v29  ;;  %v928_v2 = vmul.f32 %v927_v44, %v2317_v5  ;;  %v2722_v62 = vmul.f32 %v933_v10, %v2579_v61 }
 0x10f   : > { %v499_v55 = vadd.f32 %v497_v7, %v2530_v24  ;;  %v557_v6 = vadd.f32 %v555_v17, %v2532_v18  ;;  %v3354_v31 = vstv %s2400_s28  ;;  %v951_v44 = vmul.f32 %v949_v41, %v2437_v52  ;;  %v903_v18 = vpop.permute.xlu0 %902  ;;  %s2773_s28 = sld [smem:[#allocation4 + $0x43]] }
 0x110   : > { %v498_v43 = vadd.f32 %v496_v40, %v2536_v9  ;;  %v722_v42 = vmul.f32 %v3354_v31, %v2679_v32  ;;  %v955_v59 = vstv %s2660_s14  ;;  %v911_v9 = vpop.permute.xlu1 %910  ;;  %v3355_v10 = vstv %s2408_s29  ;;  %s2877_s14 = sld [smem:[#allocation4 + $0x57]] }
 0x111   : > { %504 = vrot.lane.b32.xlu1 %v499_v55, %s1894_s18  ;;  %561 = vrot.lane.b32.xlu2 %v557_v6, %s1895_s25  ;;  %v781_v34 = vmul.f32 %v3355_v10, %v2679_v32  ;;  %v3356_v7 = vmov %v3352_v46  ;;  %v947_v17 = vadd.f32 %v943_v30, %v937_v25  ;;  %v961_v36 = vstv %s2666_s21  ;;  %s2896_s21 = sld [smem:[#allocation4 + $0x53]] }
 0x112   : > { %v556_v46 = vmul.f32 %v3356_v7, %v2679_v32  ;;  %502 = vrot.lane.b32.xlu0 %v498_v43, %s1894_s18  ;;  %v907_v40 = vsel %vm426_vm13, %v903_v18, 0.0  ;;  %v615_v55 = vmul.f32 %v613_v14, %v2679_v32  ;;  %v3357_v6 = vmov %v3354_v31 }
 0x113   : > { %v721_v31 = vmul.f32 %v3357_v6, %v2683_v1  ;;  %v994_v10 = vadd.f32 %v992_v57, %v988_v3  ;;  %v904_v25 = vsel %vm426_vm13, %v2463_v11, %v903_v18  ;;  %v914_v30 = vsel %vm442_vm1, %v911_v9, %v2538_v37  ;;  %v3359_v37 = vld [vmem:[#allocation25_spill] sm:$0xff] }
 0x114   : > { %v614_v43 = vmul.f32 %v613_v14, %v2683_v1  ;;  %v840_v7 = vmul.f32 %v838_v50, %v2679_v32  ;;  %v724_v26 = vadd.f32 %v722_v42, %v2540_v54  ;;  %v839_v57 = vmul.f32 %v838_v50, %v2683_v1 }
 0x115   : > { %v3358_v3 = vstv %s2408_s29  ;;  %v1000_v11 = vperm.slane %v2706_v39, 0  ;;  %v3360_v18 = vperm.slane %v3359_v37, 1  ;;  %v783_v14 = vadd.f32 %v781_v34, %v2542_v45  ;;  %s2792_s29 = sld [smem:[#allocation4 + $0x44]] }
 0x116   : > { %v780_v6 = vmul.f32 %v3358_v3, %v2683_v1  ;;  %v558_v54 = vadd.f32 %v556_v46, %v2544_v47  ;;  %v1037_v42 = vstv %s2703_s1  ;;  %v3361_v12 = vperm.slane %v3359_v37, 0  ;;  %s2863_s1 = sld [smem:[#allocation4 + $0x55]] }
 0x117   : > { %v2777_v9 = vmul.f32 %v907_v40, %v3360_v18  ;;  %v3362_v3 = vperm.slane %v2398_v35, 0  ;;  %v617_v22 = vadd.f32 %v615_v55, %v2551_v23  ;;  %v723_v24 = vadd.f32 %v721_v31, %v2608_v8 }
 0x118   : > { %v2784_v50 = vmul.f32 %v904_v25, %v3361_v12  ;;  %v616_v45 = vadd.f32 %v614_v43, %v2610_v60  ;;  %v2796_v47 = vadd.f32 %v840_v7, %v2651_v38  ;;  %v1013_v34 = vstv %s2719_s20  ;;  %s2942_s20 = sld [smem:[#allocation4 + $0x59]] }
 0x119   : > { %v2788_v58 = vmul.f32 %v914_v30, %v3362_v3  ;;  %v930_v12 = vadd.f32 %v928_v2, %v922_v49  ;;  %v2800_v46 = vadd.f32 %v839_v57, %v2657_v51  ;;  %v2803_v35 = vadd.f32 %v780_v6, %v2687_v48  ;;  %729 = vrot.lane.b32.xlu1 %v724_v26, %s1896_s2 }
 0x11a   : > { %v1038_v23 = vmul.f32 %v1037_v42, %v2592_v13  ;;  %v1043_v8 = vstv %s2714_s30  ;;  %788 = vrot.lane.b32.xlu2 %v783_v14, %s1897_s13  ;;  %v953_v60 = vadd.f32 %v951_v44, %v947_v17  ;;  %v957_v38 = vmul.f32 %v955_v59, %v2777_v9  ;;  %563 = vrot.lane.b32.xlu0 %v558_v54, %s1895_s25  ;;  %s2872_s30 = sld [smem:[#allocation4 + $0x56]] }
 0x11b   : > { %v1044_v51 = vmul.f32 %v1043_v8, %v2317_v5  ;;  %v1049_v48 = vstv %s2732_s6  ;;  %v1004_v49 = vadd.f32 %v1000_v11, %v994_v10  ;;  %v1014_v26 = vmul.f32 %v1013_v34, %v2784_v50  ;;  %s1898_s6 = smov 16  }
 0x11c   : > { %v1019_v2 = vstv %s2753_s24  ;;  %v1055_v44 = vstv %s2743_s23  ;;  %v936_v17 = vadd.f32 %v2722_v62, %v930_v12  ;;  %v1050_v55 = vmul.f32 %v1049_v48, %v2579_v61  ;;  %s2910_s23 = sld [smem:[#allocation4 + $0x5c]] }
 0x11d   : > { %v1046_v40 = vadd.f32 %v1044_v51, %v1038_v23  ;;  %v2829_v31 = vmul.f32 %v1055_v44, %v2110_v63  ;;  %v963_v10 = vmul.f32 %v961_v36, %v2606_v28  ;;  %v1010_v25 = vadd.f32 %v2711_v16, %v1004_v49  ;;  %s2951_s24 = sld [smem:[#allocation4 + $0x5f]] }
 0x11e   : > { %v950_v30 = vmul.f32 %v949_v41, %v2649_v29  ;;  %v1065_v62 = vstv %s2773_s28  ;;  %v959_v43 = vadd.f32 %v957_v38, %v953_v60  ;;  %v1020_v7 = vmul.f32 %v1019_v2, %v2788_v58  ;;  %s2919_s28 = sld [smem:[#allocation4 + $0x5d]] }
 0x11f   : > { %v1052_v57 = vadd.f32 %v1050_v55, %v1046_v40  ;;  %v1058_v6 = vperm.slane %v2829_v31, 0  ;;  %v1016_v16 = vadd.f32 %v1014_v26, %v1010_v25  ;;  %v1071_v11 = vstv %s2792_s29  ;;  %s1899_s29 = smov 80  }
 0x120   : > { %v1039_v37 = vmul.f32 %v1037_v42, %v2596_v15  ;;  %v1045_v41 = vmul.f32 %v1043_v8, %v2627_v21  ;;  %v3363_v18 = vperm.slane %v2663_v19, 0  ;;  %v956_v54 = vmul.f32 %v955_v59, %v2784_v50 }
 0x121   : > { %v962_v3 = vmul.f32 %v961_v36, %v2788_v58  ;;  %v1066_v12 = vmul.f32 %v1065_v62, %v2649_v29  ;;  %v1077_v23 = vstv %s2807_s0  ;;  %v3364_v42 = vstv %s2575_s9  ;;  %622 = vrot.lane.b32.xlu1 %v617_v22, %s1898_s6  ;;  %s2885_s9 = sld [smem:[#allocation4 + $0x52]] }
 0x122   : > { %v946_v14 = vadd.f32 %v3363_v18, %v936_v17  ;;  %v1047_v60 = vadd.f32 %v1045_v41, %v1039_v37  ;;  %v981_v8 = vmul.f32 %v3364_v42, %v2596_v15  ;;  %v3365_v38 = vstv %s2588_s17  ;;  %727 = vrot.lane.b32.xlu2 %v723_v24, %s1896_s2  ;;  %620 = vrot.lane.b32.xlu0 %v616_v45, %s1898_s6  ;;  %s2889_s17 = sld [smem:[#allocation4 + $0x58]] }
 0x123   : > { %v987_v51 = vmul.f32 %v3365_v38, %v2627_v21  ;;  %v1062_v59 = vadd.f32 %v1058_v6, %v1052_v57  ;;  %v1072_v36 = vmul.f32 %v1071_v11, %v2784_v50  ;;  %v2880_v49 = vadd.f32 %v963_v10, %v959_v43  ;;  %s2959_s0 = sld [smem:[#allocation4 + $0x5a]] }
 0x124   : > { %v952_v19 = vadd.f32 %v950_v30, %v946_v14  ;;  %v2882_v26 = vadd.f32 %v1020_v7, %v1016_v16  ;;  %v1051_v44 = vmul.f32 %v1049_v48, %v2583_v53  ;;  %v1078_v40 = vmul.f32 %v1077_v23, %v2788_v58 }
 0x125   : > { %v989_v22 = vadd.f32 %v987_v51, %v981_v8  ;;  %v1068_v17 = vadd.f32 %v1066_v12, %v1062_v59  ;;  %v1059_v55 = vperm.slane %v2829_v31, 1  ;;  %v3366_v10 = vstv %s2602_s10  ;;  %s2903_s10 = sld [smem:[#allocation4 + $0x5b]] }
 0x126   : > { %v958_v24 = vadd.f32 %v956_v54, %v952_v19  ;;  %v1053_v45 = vadd.f32 %v1051_v44, %v1047_v60  ;;  %v993_v25 = vmul.f32 %v3366_v10, %v2583_v53  ;;  %v1143_v48 = vstv %s2816_s16  ;;  %s3035_s16 = sld [smem:[#allocation4 + $0x47]] }
 0x127   : > { %v1149_v30 = vstv %s2824_s19  ;;  %v1074_v43 = vadd.f32 %v1072_v36, %v1068_v17  ;;  %v1067_v7 = vmul.f32 %v1065_v62, %v2437_v52  ;;  %v1073_v31 = vmul.f32 %v1071_v11, %v2777_v9  ;;  %s3042_s19 = sld [smem:[#allocation4 + $0x48]] }
 0x128   : > { %v1151_v57 = vmul.f32 %v1149_v30, %v2627_v21  ;;  %v2906_v6 = vmul.f32 %v1077_v23, %v2606_v28  ;;  %v995_v16 = vadd.f32 %v993_v25, %v989_v22  ;;  %v1001_v37 = vperm.slane %v2706_v39, 1 }
 0x129   : > { %v1155_v41 = vstv %s2831_s5  ;;  %v964_v62 = vadd.f32 %v962_v3, %v958_v24  ;;  %v3367_v18 = vstv %s2633_s26  ;;  %v1145_v14 = vmul.f32 %v1143_v48, %v2596_v15  ;;  %s2930_s26 = sld [smem:[#allocation4 + $0x5e]]  ;;  %847 = vrot.lane.b32.xlu1 %v2796_v47, %s1899_s29 }
 0x12a   : > { %v1009_v11 = vmul.f32 %v3367_v18, %v2437_v52  ;;  %v1201_v54 = vstv %s2852_s27  ;;  %v1063_v12 = vadd.f32 %v1059_v55, %v1053_v45  ;;  %v1015_v39 = vmul.f32 %v1013_v34, %v2777_v9  ;;  %845 = vrot.lane.b32.xlu2 %v2800_v46, %s1899_s29  ;;  %786 = vrot.lane.b32.xlu0 %v2803_v35, %s1897_s13  ;;  %s3049_s5 = sld [smem:[#allocation4 + $0x4a]] }
 0x12b   : > { %v2927_v23 = vmul.f32 %v1019_v2, %v2606_v28  ;;  %v1161_v3 = vstv %s2841_s7  ;;  %v2936_v60 = vadd.f32 %v1078_v40, %v1074_v43  ;;  %v1153_v34 = vadd.f32 %v1151_v57, %v1145_v14  ;;  %s2965_s7 = sld [smem:[#allocation4 + $0x60]] }
 0x12c   : > { %v1157_v2 = vmul.f32 %v1155_v41, %v2583_v53  ;;  %v1207_v42 = vstv %s2863_s1  ;;  %v1005_v8 = vadd.f32 %v1001_v37, %v995_v16  ;;  %v1171_v47 = vstv %s2847_s11  ;;  %s2972_s1 = sld [smem:[#allocation4 + $0x61]] }
 0x12d   : > { %v1203_v38 = vmul.f32 %v1201_v54, %v2596_v15  ;;  %v1209_v46 = vmul.f32 %v1207_v42, %v2627_v21  ;;  %v2954_v51 = vmul.f32 %v1161_v3, %v2110_v63  ;;  %v3266_v19 = vstv %s2885_s9  ;;  %s3086_s11 = sld [smem:[#allocation4 + $0x4b]] }
 0x12e   : > { %v1213_v59 = vstv %s2872_s30  ;;  %v1219_v36 = vstv %s2877_s14  ;;  %v1069_v35 = vadd.f32 %v1067_v7, %v1063_v12  ;;  %v1173_v44 = vmul.f32 %v1171_v47, %v2437_v52  ;;  %s1530_s27 = sld [smem:[#allocation4 + $0x17]] }
 0x12f   : > { %v3265_v22 = vstv %s2896_s21  ;;  %v1211_v24 = vadd.f32 %v1209_v46, %v1203_v38  ;;  %v1159_v17 = vadd.f32 %v1157_v2, %v1153_v34  ;;  %v1165_v40 = vperm.slane %v2954_v51, 1  ;;  %s1531_s30 = sld [smem:[#allocation4 + $0x18]] }
 0x130   : > { %v1215_v55 = vmul.f32 %v1213_v59, %v2583_v53  ;;  %v2970_v45 = vmul.f32 %v1219_v36, %v2110_v63  ;;  %v1075_v10 = vadd.f32 %v1073_v31, %v1069_v35  ;;  %v1011_v25 = vadd.f32 %v1009_v11, %v1005_v8  ;;  %s3118_s14 = sld [smem:[#allocation4 + $0x1a]] }
 0x131   : > { %v1179_v43 = vmul.f32 %v3266_v19, %v2777_v9  ;;  %v1259_v7 = vstv %s2903_s10  ;;  %v1265_v37 = vstv %s2910_s23  ;;  %v1271_v18 = vstv %s2919_s28  ;;  %1026 = vrot.lane.b32.xlu1 %v2882_v26, %s1895_s25  ;;  %s1608_s10 = sshll.u32 %s1874_s15, 1 }
 0x132   : > { %v1217_v57 = vadd.f32 %v1215_v55, %v1211_v24  ;;  %v1223_v16 = vperm.slane %v2970_v45, 1  ;;  %v2984_v14 = vmul.f32 %v3265_v22, %v2606_v28  ;;  %v1261_v12 = vmul.f32 %v1259_v7, %v2596_v15  ;;  %968 = vrot.lane.b32.xlu2 %v964_v62, %s1894_s18  ;;  %970 = vrot.lane.b32.xlu0 %v2880_v49, %s1894_s18  ;;  %s3027_s18 = sld [smem:[#allocation4 + $0x46]] }
 0x133   : > { %v1267_v31 = vmul.f32 %v1265_v37, %v2627_v21  ;;  %v1277_v11 = vstv %s2930_s26  ;;  %v1017_v3 = vadd.f32 %v1015_v39, %v1011_v25  ;;  %v1169_v34 = vadd.f32 %v1165_v40, %v1159_v17  ;;  %s1377_s26 = scalar_lea.hbm %s3238_s3, %s1608_s10 }
 0x134   : > { %v1229_v2 = vstv %s2889_s17  ;;  %v1278_v8 = vmul.f32 %v1277_v11, %v2110_v63  ;;  %v1235_v46 = vstv %s2942_s20  ;;  %v1273_v26 = vmul.f32 %v1271_v18, %v2583_v53  ;;  %s3127_s17 = sld [smem:[#allocation4 + $0x4c]]  ;;  %s1381_s15 = sshll.u32 %s1377_s26, 4  ;;  %s1382_s15 = int_to_ptr.hbm [resolvable:$true] %s1381_s15 }
 0x135   : > { %v1231_v38 = vmul.f32 %v1229_v2, %v2437_v52  ;;  %v1269_v36 = vadd.f32 %v1267_v31, %v1261_v12  ;;  %v1227_v35 = vadd.f32 %v1223_v16, %v1217_v57  ;;  %v1241_v62 = vstv %s2959_s0  ;;  %s1806_s0 = sshra.s32 %s1382_s15, 4  ;;  %s1807_s0 = int_to_ptr.hbm [resolvable:$true] %s1806_s0 }
 0x136   : > { %v1281_v24 = vperm.slane %v1278_v8, 1  ;;  %v1287_v39 = vstv %s2951_s24  ;;  %v1293_v40 = vstv %s2965_s7  ;;  %v1144_v55 = vmul.f32 %v1143_v48, %v2592_v13  ;;  %s1367_s24 = scalar_lea.sflag [#allocation6], %s2020_s4  ;;  %s1808_s7 = scalar_lea.hbm %s1807_s0, 2 }
 0x137   : > { %v1275_v17 = vadd.f32 %v1273_v26, %v1269_v36  ;;  %v1150_v49 = vmul.f32 %v1149_v30, %v2317_v5  ;;  %v1081_v25 = vadd.f32 %v2906_v6, %v1075_v10  ;;  %v1023_v12 = vadd.f32 %v2927_v23, %v1017_v3  ;;  %p1809_p1 = scmp.ne.s32.totalorder %s1807_s0, %s1808_s7  ;;  %p1813_p11 = scmp.lt.s32.totalorder %s1807_s0, %s3238_s3 }
 0x138   : > { %v1289_v31 = vmul.f32 %v1287_v39, %v2437_v52  ;;  %v1299_v11 = vstv %s2972_s1  ;;  %v1237_v57 = vmul.f32 %v1235_v46, %v2777_v9  ;;  %v1202_v36 = vmul.f32 %v1201_v54, %v2592_v13 }
 0x139   : > { %v1285_v16 = vadd.f32 %v1281_v24, %v1275_v17  ;;  %v1208_v26 = vmul.f32 %v1207_v42, %v2317_v5  ;;  %v1175_v22 = vadd.f32 %v1173_v44, %v1169_v34  ;;  %v1233_v48 = vadd.f32 %v1231_v38, %v1227_v35  ;;  %1086 = vrot.lane.b32.xlu1 %v1081_v25, %s1898_s6  ;;  %p1810_p3 = pnand %p1809_p1, %p1992_p2 }
 0x13a   : > { %v1243_v30 = vmul.f32 %v1241_v62, %v2606_v28  ;;  %v1295_v6 = vmul.f32 %v1293_v40, %v2777_v9  ;;  %v1301_v23 = vmul.f32 %v1299_v11, %v2606_v28  ;;  %v1152_v10 = vadd.f32 %v1150_v49, %v1144_v55  ;;  %1028 = vrot.lane.b32.xlu2 %v1023_v12, %s1895_s25  ;;  %s3038_s25 = sld [smem:[#allocation4 + $0x49]] }
 0x13b   : > { %v1210_v3 = vadd.f32 %v1208_v26, %v1202_v36  ;;  %v1214_v19 = vmul.f32 %v1213_v59, %v2579_v61  ;;  %v1291_v54 = vadd.f32 %v1289_v31, %v1285_v16  ;;  %v1260_v42 = vmul.f32 %v1259_v7, %v2592_v13  ;;  %1084 = vrot.lane.b32.xlu0 %v2936_v60, %s1898_s6  ;;  %s1532_s6 = sld [smem:[#allocation4 + $0x19]]  ;;  %p1811_p7 = pneg %p1810_p3 }
 0x13c   : > { %v1266_v44 = vmul.f32 %v1265_v37, %v2317_v5  ;;  %v1239_v34 = vadd.f32 %v1237_v57, %v1233_v48  ;;  %v1156_v38 = vmul.f32 %v1155_v41, %v2579_v61  ;;  %v1222_v35 = vperm.slane %v2970_v45, 0 }
 0x13d   : > { %v1216_v59 = vadd.f32 %v1214_v19, %v1210_v3  ;;  %v1297_v24 = vadd.f32 %v1295_v6, %v1291_v54  ;;  %v1272_v7 = vmul.f32 %v1271_v18, %v2579_v61  ;;  %v1280_v37 = vperm.slane %v1278_v8, 0 }
 0x13e   : > { %v1268_v17 = vadd.f32 %v1266_v44, %v1260_v42  ;;  %v1181_v55 = vadd.f32 %v1179_v43, %v1175_v22  ;;  %v1158_v49 = vadd.f32 %v1156_v38, %v1152_v10  ;;  %v1164_v60 = vperm.slane %v2954_v51, 0 }
 0x13f   : > { %v1230_v41 = vmul.f32 %v1229_v2, %v2649_v29  ;;  %v1288_v45 = vmul.f32 %v1287_v39, %v2649_v29  ;;  %v1172_v25 = vmul.f32 %v1171_v47, %v2649_v29  ;;  %v1226_v12 = vadd.f32 %v1222_v35, %v1216_v59 }
 0x140   : > { %v1274_v19 = vadd.f32 %v1272_v7, %v1268_v17  ;;  %v1236_v18 = vmul.f32 %v1235_v46, %v2784_v50  ;;  %v1245_v22 = vadd.f32 %v1243_v30, %v1239_v34  ;;  %v1303_v43 = vadd.f32 %v1301_v23, %v1297_v24 }
 0x141   : > { %v1294_v2 = vmul.f32 %v1293_v40, %v2784_v50  ;;  %v1187_v8 = vadd.f32 %v2984_v14, %v1181_v55  ;;  %v1168_v39 = vadd.f32 %v1164_v60, %v1158_v49  ;;  %v3368_v31 = vstv %s2885_s9  ;;  %s3122_s9 = sld [smem:[#allocation4 + $0x1b]] }
 0x142   : > { %v1284_v51 = vadd.f32 %v1280_v37, %v1274_v19  ;;  %v1178_v47 = vmul.f32 %v3368_v31, %v2784_v50  ;;  %v1232_v57 = vadd.f32 %v1230_v41, %v1226_v12  ;;  %1250 = vrot.lane.b32.xlu1 %v1245_v22, %s1897_s13  ;;  %1308 = vrot.lane.b32.xlu2 %v1303_v43, %s1899_s29  ;;  %v1095_v36 = vstv %s3027_s18 }
 0x143   : > { %1192 = vrot.lane.b32.xlu0 %v1187_v8, %s1896_s2  ;;  %v1174_v16 = vadd.f32 %v1172_v25, %v1168_v39  ;;  %v1242_v14 = vmul.f32 %v1241_v62, %v2788_v58  ;;  %v1300_v48 = vmul.f32 %v1299_v11, %v2788_v58  ;;  %v1101_v30 = vstv %s3035_s16  ;;  %s1812_s16 = scalar_lea.hbm %s3238_s3, 4 }
 0x144   : > { %v1290_v46 = vadd.f32 %v1288_v45, %v1284_v51  ;;  %v1238_v40 = vadd.f32 %v1236_v18, %v1232_v57  ;;  %v1113_v6 = vstv %s3038_s25  ;;  %v3369_v10 = vstv %s2896_s21  ;;  %s1500_s21 = sshll.u32 %s2020_s4, 1  ;;  %p1814_p12 = scmp.lt.s32.totalorder %s1812_s16, %s1808_s7 }
 0x145   : > { %v1180_v23 = vadd.f32 %v1178_v47, %v1174_v16  ;;  %v1184_v3 = vmul.f32 %v3369_v10, %v2788_v58  ;;  %v1102_v54 = vmul.f32 %v1101_v30, %v2317_v5  ;;  %v1107_v42 = vstv %s3042_s19 }
 0x146   : > { %v1296_v26 = vadd.f32 %v1294_v2, %v1290_v46  ;;  %v1114_v44 = vmul.f32 %v1113_v6, %v2110_v63  ;;  %v1096_v34 = vmul.f32 %v1095_v36, %v2592_v13  ;;  %v1244_v38 = vadd.f32 %v1242_v14, %v1238_v40  ;;  %v3370_v46 = vld [vmem:[#allocation28_spill] sm:$0xff]  ;;  %v3371_v40 = vld [vmem:[#allocation27_spill] sm:$0xff]  ;;  %p1815_p13 = por %p1814_p12, %p1813_p11 }
 0x147   : > { %v1123_v62 = vstv %s3049_s5  ;;  %v1097_v59 = vmul.f32 %v1095_v36, %v2596_v15  ;;  %v1103_v11 = vmul.f32 %v1101_v30, %v2627_v21  ;;  %v1108_v24 = vmul.f32 %v1107_v42, %v2579_v61  ;;  %v3372_v36 = vld [vmem:[#allocation26_spill] sm:$0xff] }
 0x148   : > { %v1302_v35 = vadd.f32 %v1300_v48, %v1296_v26  ;;  %v1116_v17 = vperm.slane %v1114_v44, 0  ;;  %v1104_v7 = vadd.f32 %v1102_v54, %v1096_v34  ;;  %v1186_v37 = vadd.f32 %v1184_v3, %v1180_v23  ;;  %v3373_v3 = vld [vmem:[#allocation24_spill] sm:$0xff]  ;;  %p1816_p0 = pnand %p1815_p13, %p1811_p7 }
 0x149   : > { %v1109_v5 = vmul.f32 %v1107_v42, %v2583_v53  ;;  %v1105_v55 = vadd.f32 %v1103_v11, %v1097_v59  ;;  %v1124_v63 = vmul.f32 %v1123_v62, %v2649_v29  ;;  %v1117_v15 = vperm.slane %v1114_v44, 1  ;;  %v3374_v44 = vld [vmem:[#allocation23_spill] sm:$0xff] }
 0x14a   : > { %1248 = vrot.lane.b32.xlu1 %v1244_v38, %s1897_s13  ;;  %1306 = vrot.lane.b32.xlu2 %v1302_v35, %s1899_s29  ;;  %v1110_v13 = vadd.f32 %v1108_v24, %v1104_v7  ;;  %v1129_v60 = vstv %s3086_s11  ;;  %s1529_s13 = sld [smem:[#allocation4 + $0x16]]  ;;  %v644_v30 = vstv %s1530_s27  ;;  %vm565_vm15 = vcmask 261120   ;;  %s233_s29 = scalar_lea.vmem [#allocation11], %s1500_s21 }
 0x14b   : > { %1190 = vrot.lane.b32.xlu0 %v1186_v37, %s1896_s2  ;;  %v1111_v21 = vadd.f32 %v1109_v5, %v1105_v55  ;;  %v1130_v41 = vmul.f32 %v1129_v60, %v2784_v50  ;;  %s1528_s2 = sld [smem:[#allocation4 + $0x15]]  ;;  %v650_v6 = vstv %s1531_s30  ;;  %v646_v54 = vmul.f32 %v644_v30, %v3373_v3  ;;  %s1379_s20 = sshll.u32 %s233_s29, 4  ;;  %s1380_s20 = int_to_ptr.vmem [resolvable:$true] %s1379_s20 }
 0x14c   : > { %v1120_v49 = vadd.f32 %v1116_v17, %v1110_v13  ;;  %v651_v34 = vmul.f32 %v650_v6, %v3374_v44  ;;  %v660_v11 = vstv %s1532_s6  ;;  %v666_v17 = vstv %s3118_s14 }
 0x14d   : > { %v3084_v61 = vadd.f32 %v1117_v15, %v1111_v21  ;;  %v1125_v7 = vmul.f32 %v1123_v62, %v2437_v52  ;;  %v662_v37 = vmul.f32 %v660_v11, %v2405_v4  ;;  %vm731_vm4 = vcmask 916480  }
 0x14e   : > { %v1126_v53 = vadd.f32 %v1124_v63, %v1120_v49  ;;  %v654_v24 = vperm.slane %v651_v34, 1  ;;  %v653_v55 = vperm.slane %v651_v34, 0  ;;  %v661_v63 = vmul.f32 %v660_v11, %v2415_v56 }
 0x14f   : > { %v672_v13 = vstv %s3122_s9  ;;  %vm849_vm5 = vcmask 654336   ;;  %v668_v52 = vmul.f32 %v666_v17, %v2475_v33  ;;  %v1127_v4 = vadd.f32 %v1125_v7, %v3084_v61 }
 0x150   : > { %v3090_v19 = vadd.f32 %v1130_v41, %v1126_v53  ;;  %v638_v57 = vstv %s1529_s13  ;;  %v1135_v53 = vstv %s3127_s17 }
 0x151   : > { %v632_v47 = vstv %s1528_s2  ;;  %v640_v14 = vmul.f32 %v638_v57, %v3371_v40  ;;  %v639_v48 = vmul.f32 %v638_v57, %v2258_v0  ;;  %v645_v0 = vmul.f32 %v644_v30, %v2162_v27 }
 0x152   : > { %v634_v16 = vmul.f32 %v632_v47, %v3370_v46  ;;  %v633_v26 = vmul.f32 %v632_v47, %v3372_v36  ;;  %v1131_v27 = vmul.f32 %v1129_v60, %v2777_v9  ;;  %v674_v60 = vmul.f32 %v672_v13, %v2679_v32 }
 0x153   : > { %v1137_v57 = vmul.f32 %v1135_v53, %v2606_v28  ;;  %v667_v30 = vmul.f32 %v666_v17, %v2471_v20 }
 0x154   : > { %v642_v10 = vadd.f32 %v640_v14, %v634_v16  ;;  %v641_v59 = vadd.f32 %v639_v48, %v633_v26  ;;  %v1133_v46 = vadd.f32 %v1131_v27, %v1127_v4 }
 0x156   : > { %v648_v35 = vadd.f32 %v646_v54, %v642_v10  ;;  %v647_v5 = vadd.f32 %v645_v0, %v641_v59  ;;  %v1139_v54 = vadd.f32 %v1137_v57, %v1133_v46 }
 0x158   : > { %v658_v15 = vadd.f32 %v654_v24, %v648_v35  ;;  %v657_v40 = vadd.f32 %v653_v55, %v647_v5 }
 0x15a   : > { %v664_v41 = vadd.f32 %v662_v37, %v658_v15  ;;  %v663_v3 = vadd.f32 %v661_v63, %v657_v40 }
 0x15c   : > { %v670_v36 = vadd.f32 %v668_v52, %v664_v41  ;;  %v669_v63 = vadd.f32 %v667_v30, %v663_v3 }
 0x15e   : > { %v676_v10 = vadd.f32 %v674_v60, %v670_v36 }
 0x16b   : > { %v3092_v45 = vpop.permute.xlu2 %561 }
 0x16c   : > { %v569_v20 = vsel %vm565_vm15, 0.0, %v3092_v45 }
 0x174   : > { %v3094_v29 = vpop.permute.xlu2 %788 }
 0x175   : > { %v794_v56 = vsel %vm790_vm3, %v3094_v29, 0.0 }
 0x17c   : > { %v3100_v18 = vpop.permute.xlu2 %727 }
 0x183   : > { %v3096_v25 = vpop.permute.xlu1 %504 }
 0x184   : > { %v3098_v12 = vpop.permute.xlu0 %502  ;;  %v3104_v51 = vpop.permute.xlu2 %845 }
 0x185   : > { %v507_v61 = vsel %vm506_vm6, %v3098_v12, %v3096_v25  ;;  %v673_v25 = vmul.f32 %v672_v13, %v2683_v1  ;;  %v510_v55 = vsel %vm506_vm6, 0.0, %v3098_v12 }
 0x18b   : > { %v3102_v22 = vpop.permute.xlu1 %729 }
 0x18c   : > { %v564_v43 = vpop.permute.xlu0 %563  ;;  %v3110_v8 = vpop.permute.xlu2 %968  ;;  %v735_v9 = vsel %vm731_vm4, %v3102_v22, 0.0  ;;  %v732_v24 = vsel %vm731_vm4, %v3100_v18, %v3102_v22 }
 0x18d   : > { %v566_v49 = vsel %vm565_vm15, %v3092_v45, %v564_v43  ;;  %v737_v32 = vadd.f32 %v735_v9, %v507_v61  ;;  %v736_v22 = vadd.f32 %v732_v24, %v510_v55  ;;  %v975_v27 = vsel %vm506_vm6, 0.0, %v3110_v8 }
 0x18e   : > { %v796_v47 = vadd.f32 %v794_v56, %v566_v49 }
 0x193   : > { %v3106_v2 = vpop.permute.xlu1 %622 }
 0x194   : > { %v3108_v50 = vpop.permute.xlu0 %620  ;;  %v1029_v38 = vpop.permute.xlu2 %1028 }
 0x195   : > { %v625_v26 = vsel %vm624_vm7, %v3108_v50, %v3106_v2 }
 0x19b   : > { %v3112_v39 = vpop.permute.xlu1 %847 }
 0x19c   : > { %v3114_v31 = vpop.permute.xlu0 %786  ;;  %v853_v33 = vsel %vm849_vm5, %v3112_v39, 0.0  ;;  %v1309_v16 = vpop.permute.xlu2 %1308 }
 0x19d   : > { %v855_v6 = vadd.f32 %v853_v33, %v625_v26  ;;  %v791_v2 = vsel %vm790_vm3, %v3114_v31, %v3094_v29  ;;  %v1136_v29 = vmul.f32 %v1135_v53, %v2788_v58  ;;  %v850_v31 = vsel %vm849_vm5, %v3104_v51, %v3112_v39 }
 0x19e   : > { %v795_v5 = vadd.f32 %v791_v2, %v569_v20  ;;  %v628_v58 = vsel %vm624_vm7, 0.0, %v3108_v50  ;;  %v675_v51 = vadd.f32 %v673_v25, %v669_v63 }
 0x19f   : > { %v1141_v17 = vadd.f32 %v1139_v54, %v855_v6  ;;  %v854_v39 = vadd.f32 %v850_v31, %v628_v58  ;;  %v1138_v53 = vadd.f32 %v1136_v29, %v3090_v19 }
 0x1a1   : > { %v1140_v60 = vadd.f32 %v1138_v53, %v854_v39 }
 0x1a3   : > { %v3124_v23 = vpop.permute.xlu1 %1026 }
 0x1a4   : > { %v971_v42 = vpop.permute.xlu0 %970  ;;  %v1030_v14 = vsel %vm565_vm15, %v3124_v23, %v1029_v38  ;;  %v1313_v38 = vsel %vm849_vm5, %v1309_v16, 0.0  ;;  %v1033_v13 = vsel %vm565_vm15, 0.0, %v3124_v23  ;;  %v1307_v15 = vpop.permute.xlu2 %1306 }
 0x1a5   : > { %v972_v28 = vsel %vm506_vm6, %v3110_v8, %v971_v42  ;;  %v1035_v44 = vadd.f32 %v1030_v14, %v737_v32  ;;  %v1034_v12 = vadd.f32 %v1033_v13, %v736_v22  ;;  %v1310_v23 = vsel %vm849_vm5, %v1307_v15, %v1309_v16 }
 0x1a6   : > { %v977_v59 = vadd.f32 %v972_v28, %v676_v10 }
 0x1ab   : > { %v1087_v21 = vpop.permute.xlu1 %1086 }
 0x1ad   : > { %v1085_v62 = vpop.permute.xlu0 %1084 }
 0x1ae   : > { %v1088_v43 = vsel %vm624_vm7, %v1085_v62, %v1087_v21  ;;  %v1091_v7 = vsel %vm624_vm7, 0.0, %v1085_v62  ;;  %v976_v62 = vadd.f32 %v975_v27, %v675_v51 }
 0x1af   : > { %v1093_v48 = vadd.f32 %v1088_v43, %v796_v47  ;;  %v1092_v21 = vadd.f32 %v1091_v7, %v795_v5 }
 0x1b1   : > { %v1315_v11 = vadd.f32 %v1313_v38, %v1093_v48  ;;  %v1314_v8 = vadd.f32 %v1310_v23, %v1092_v21 }
 0x1b4   : > { %v1251_v34 = vpop.permute.xlu1 %1250 }
 0x1b5   : > { %v1255_v42 = vsel %vm790_vm3, %v1251_v34, 0.0  ;;  %v1193_v0 = vpop.permute.xlu0 %1192 }
 0x1b6   : > { %v1257_v35 = vadd.f32 %v1255_v42, %v1035_v44  ;;  %v1197_v1 = vsel %vm731_vm4, %v1193_v0, 0.0 }
 0x1b7   : > { %v1199_v37 = vadd.f32 %v1197_v1, %v977_v59 }
 0x1b8   : > { %v1317_v45 = vadd.f32 %v1315_v11, %v1257_v35 }
 0x1b9   : > { %v1319_v18 = vadd.f32 %v1199_v37, %v1141_v17 }
 0x1bb   : > { %v1321_v49 = vadd.f32 %v1319_v18, %v1317_v45 }
 0x1bc   : > { %v1249_v52 = vpop.permute.xlu1 %1248 }
 0x1bd   : > { %v1606_v4 = vmul.f32 -1.442695, %v1321_v49  ;;  %v1252_v41 = vsel %vm790_vm3, %v1249_v52, %v1251_v34  ;;  %v1191_v56 = vpop.permute.xlu0 %1190 }
 0x1be   : > { %v1256_v9 = vadd.f32 %v1252_v41, %v1034_v12  ;;  %v1194_v50 = vsel %vm731_vm4, %v1191_v56, %v1193_v0 }
 0x1bf   : > { %1709 = vpow2.f32 %v1606_v4  ;;  %v1198_v43 = vadd.f32 %v1194_v50, %v976_v62 }
 0x1c0   : > { %v1316_v47 = vadd.f32 %v1314_v8, %v1256_v9 }
 0x1c1   : > { %v1318_v57 = vadd.f32 %v1198_v43, %v1140_v60 }
 0x1c3   : > { %v1320_v33 = vadd.f32 %v1318_v57, %v1316_v47 }
 0x1c5   : > { %v1710_v19 = vpop.eup %1709  ;;  %v1605_v46 = vmul.f32 -1.442695, %v1320_v33 }
 0x1c6   : > { %v1329_v61 = vadd.f32 1.0, %v1710_v19 }
 0x1c7   : > { %1711 = vpow2.f32 %v1605_v46 }
 0x1c8   : > { %1713 = vrcp.f32 %v1329_v61  ;;  %v1356_v30 = vand.u32 2147483648, %v1329_v61  ;;  %vm1350_vm9 = vweird.f32 %v1329_v61  ;;  %v1354_v10 = vand.u32 2147483647, %v1329_v61 }
 0x1ca   : > { %v1357_v44 = vor.u32 1.1754944e-38, %v1356_v30  ;;  %vm1355_vm12 = vcmp.eq.f32.partialorder %v1354_v10, 8.507059e+37 }
 0x1cd   : > { %v1712_v16 = vpop.eup %1711 }
 0x1ce   : > { %v1714_v40 = vpop.eup %1713  ;;  %v1328_v14 = vadd.f32 1.0, %v1712_v16 }
 0x1cf   : > { %v1346_v36 = vmul.f32 %v1714_v40, %v1329_v61  ;;  %vm1351_vm8 = vweird.f32 %v1714_v40 }
 0x1d0   : > { %1715 = vrcp.f32 %v1328_v14  ;;  %vm1352_vm10 = vmor %vm1350_vm9, %vm1351_vm8  ;;  %v1341_v54 = vand.u32 2147483648, %v1328_v14  ;;  %v1339_v38 = vand.u32 2147483647, %v1328_v14  ;;  %vm1335_vm13 = vweird.f32 %v1328_v14 }
 0x1d1   : > { %v1347_v32 = vsub.f32 1.0, %v1346_v36 }
 0x1d2   : > { %v1342_v42 = vor.u32 1.1754944e-38, %v1341_v54  ;;  %vm1340_vm1 = vcmp.eq.f32.partialorder %v1339_v38, 8.507059e+37 }
 0x1d3   : > { %v1348_v26 = vmul.f32 %v1714_v40, %v1347_v32 }
 0x1d5   : > { %v1349_v28 = vadd.f32 %v1714_v40, %v1348_v26 }
 0x1d6   : > { %v1716_v48 = vpop.eup %1715 }
 0x1d7   : > { %v1331_v6 = vmul.f32 %v1716_v48, %v1328_v14  ;;  %v1353_v25 = vsel %vm1352_vm10, %v1714_v40, %v1349_v28  ;;  %vm1336_vm11 = vweird.f32 %v1716_v48 }
 0x1d8   : > { %v1358_v2 = vsel %vm1355_vm12, %v1357_v44, %v1353_v25  ;;  %vm1337_vm14 = vmor %vm1335_vm13, %vm1336_vm11 }
 0x1d9   : > { %v1332_v3 = vsub.f32 1.0, %v1331_v6  ;;  %v1362_v20 = vrot.slane %v1358_v2, 7 }
 0x1db   : > { %v1333_v34 = vmul.f32 %v1716_v48, %v1332_v3 }
 0x1dd   : > { %v1334_v59 = vadd.f32 %v1716_v48, %v1333_v34 }
 0x1df   : > { %v1338_v0 = vsel %vm1337_vm14, %v1716_v48, %v1334_v59 }
 0x1e0   : > { %v1343_v11 = vsel %vm1340_vm1, %v1342_v42, %v1338_v0 }
 0x1e1   : > { %v1363_v35 = vsel %vm270_vm2, %v1343_v11, %v1362_v20 }
 0x1e2   : > { %1365 = vst.msk [vmem:[%s233_s29] sm:$0x3] %vm2028_vm0, %v1363_v35 }
 0x1e3   : > { %1819 = shalt.err (!%p1816_p0)
}
 0x1e4   : > { %1622 = dma.vmem_to_hbm [thread:$0]  (%p1992_p2), %s1380_s20, 32, %s1382_s15, %s1367_s24  }
 0x1e5 PF: > { %s3376_s4 = sld [smem:[#allocation19_spill]]  ;;  %s1393_s5 = sand.u32 1, %s1862_s12  }
 0x1e6   : > { %p1636_p4 = pnand %p1492_p8, %p1965_p5  ;;  %s1394_s11 = scalar_lea.sflag [#allocation6], %s1393_s5 }
 0x1e8   : > { %p1637_p6 = pneg %p1636_p4 }
 0x1ea   : > { %1857 = dma.done.wait (%p1637_p6), %s1394_s11, 32  }
 0x1eb   : > { %1859 = vsyncadd (%p1637_p6), %s1394_s11, 4294967264  ;;  %s21_s17 = sadd.s32 1, %s3376_s4   ;;  %s3377_s12 = sld [smem:[#allocation16_spill]] }
 0x1ec   : > { %p18_p9 = scmp.ge.s32.totalorder %s21_s17, 4   ;;  %s3378_s13 = sld [smem:[#allocation17_spill]] }
 0x1ed   : > { %s3379_s14 = sld [smem:[#allocation21_spill]] }
 0x1ee   : > { %s3380_s15 = sld [smem:[#allocation18_spill]]  ;;  %20 = sbr.rel (!%p18_p9) target bundleno = 12 (0xc), region = 95 }
 0x1ef   : > { %s3381_s16 = sld [smem:[#allocation20_spill]] }
 0x1f3   :  { %1400 = vsyncpa [#allocation5], 1 }
 0x1f4   :  { %1402 = vsyncpa [#allocation5 + $0x1], 1 }
 0x1f5   :  { %1403 = vsyncpa [#allocation10], 1 }
 0x1f6   :  { %1405 = vsyncpa [#allocation10 + $0x1], 1 }
 0x1f7   :  { %1406 = vsyncpa [#allocation6], 1 }
 0x1f8   :  { %1408 = vsyncpa [#allocation6 + $0x1], 1 }
 0x1f9   :  { %1409 = vsyncpa [#allocation7], 1 }
 0x1fa   :  { %1411 = vsyncpa [#allocation7 + $0x1], 1 }

</bundles_post_ra>
